<compile_context>
chip_gen: v7x
topology: tpu7x:2x2x1
jax: 0.10.0
libtpu: 0.0.40
codegen_flags: <defaults>
</compile_context>

<pallas_src>
import math
from functools import partial

import jax
import jax.numpy as jnp
from jax.experimental import pallas as pl
from jax.experimental.pallas import tpu as pltpu


def _layer_norm(v, g, b, eps=1e-5):
    mu = jnp.mean(v, axis=-1, keepdims=True)
    var = jnp.mean((v - mu) ** 2, axis=-1, keepdims=True)
    return (v - mu) * jax.lax.rsqrt(var + eps) * g + b


def encoder_layer_kernel(xq_ref, xf_ref,
                         wq_ref, bq_ref, wk_ref, bk_ref, wv_ref, bv_ref,
                         wo_ref, bo_ref, g1_ref, be1_ref,
                         w1_ref, b1_ref, w2_ref, b2_ref, g2_ref, be2_ref,
                         *rest, n_heads, write_sim):
    if write_sim:
        out_ref, attn_ref, sim_ref, kc_ref, vc_ref = rest
    else:
        out_ref, attn_ref, kc_ref, vc_ref = rest
        sim_ref = None

    f32, bf16 = jnp.float32, jnp.bfloat16
    xq = xq_ref[0]                        # (TQ, D) f32 residual stream (query rows)
    tq, d_model = xq.shape
    dk = d_model // n_heads
    scale = 1.0 / math.sqrt(dk)

    # K/V depend only on the full sequence: project once per batch element
    # (qi == 0) into bf16 VMEM scratch, reuse for the remaining query tiles.
    @pl.when(pl.program_id(1) == 0)
    def _():
        xf = xf_ref[0]                    # (L, D) bf16 (cast host-side)
        for h in range(n_heads):
            k_h = jnp.dot(xf, wk_ref[h], preferred_element_type=f32) + bk_ref[h]
            v_h = jnp.dot(xf, wv_ref[h], preferred_element_type=f32) + bv_ref[h]
            kc_ref[h] = k_h.astype(bf16)
            vc_ref[h] = v_h.astype(bf16)

    xq16 = xq.astype(bf16)
    nt = (((1,), (1,)), ((), ()))         # A @ B^T contraction (no transpose op)
    new_x = jnp.zeros((tq, d_model), f32)

    # Unrolled per-head loop: only one head's (TQ, L) score block is live at a
    # time; output projection accumulates straight into the (TQ, D) f32 acc.
    for h in range(n_heads):
        q_h = jnp.dot(xq16, wq_ref[h], preferred_element_type=f32) + bq_ref[h]  # (TQ, dk)
        k_h = kc_ref[h]                                                         # (L, dk) bf16
        v_h = vc_ref[h]                                                         # (L, dk) bf16

        s_h = jax.lax.dot_general(q_h.astype(bf16), k_h, nt,
                                  preferred_element_type=f32) * scale           # (TQ, L)
        if sim_ref is not None:
            sim_ref[0, h] = s_h.astype(sim_ref.dtype)

        m = jnp.max(s_h, axis=-1, keepdims=True)
        e = jnp.exp(s_h - m)
        # approx reciprocal (EUP): attn rows sum to 1 only to ~1e-4 relative.
        p = e * pl.reciprocal(jnp.sum(e, axis=-1, keepdims=True), approx=True)
        attn_ref[0, h] = p.astype(attn_ref.dtype)

        o_h = jnp.dot(p.astype(bf16), v_h, preferred_element_type=f32)          # (TQ, dk)
        new_x = new_x + jnp.dot(o_h.astype(bf16), wo_ref[h],
                                preferred_element_type=f32)                     # (TQ, D)

    new_x = new_x + bo_ref[...]

    # Residual + norm1 (dropout == identity in eval mode).
    x1 = _layer_norm(xq + new_x, g1_ref[...], be1_ref[...])

    # Position-wise FFN: Conv1d(kernel_size=1) == per-position linear.
    y = jnp.dot(x1.astype(bf16), w1_ref[...], preferred_element_type=f32) + b1_ref[...]
    y = jnp.maximum(y, 0.0)                                                      # relu
    y = jnp.dot(y.astype(bf16), w2_ref[...], preferred_element_type=f32) + b2_ref[...]

    # Residual + norm2.
    out_ref[0] = _layer_norm(x1 + y, g2_ref[...], be2_ref[...]).astype(out_ref.dtype)


_KPARAMS = ["wq3", "bq3", "wk3", "bk3", "wv3", "bv3", "wo3", "bo",
            "g1", "be1", "w1", "b1", "w2", "b2", "g2", "be2"]


def _prepare_kernel_params(params, d_model, n_heads):
    """Host-side layout plumbing: per-head weight slabs + bf16 matmul operands."""
    dk = d_model // n_heads
    bf16, f32 = jnp.bfloat16, jnp.float32

    def per_head_cols(w):   # (D, D) -> (H, D, dk): head h = columns [h*dk, (h+1)*dk)
        return w.reshape(d_model, n_heads, dk).transpose(1, 0, 2).astype(bf16)

    return {
        "wq3": per_head_cols(params["wq_t"]),
        "bq3": params["bq"].reshape(n_heads, 1, dk).astype(f32),
        "wk3": per_head_cols(params["wk_t"]),
        "bk3": params["bk"].reshape(n_heads, 1, dk).astype(f32),
        "wv3": per_head_cols(params["wv_t"]),
        "bv3": params["bv"].reshape(n_heads, 1, dk).astype(f32),
        # output projection: per-head (dk, D) row slabs of wo_t
        "wo3": params["wo_t"].reshape(n_heads, dk, d_model).astype(bf16),
        "bo": params["bo"].astype(f32),
        "g1": params["g1"].astype(f32), "be1": params["be1"].astype(f32),
        "w1": params["w1_t"].astype(bf16), "b1": params["b1"].astype(f32),
        "w2": params["w2_t"].astype(bf16), "b2": params["b2"].astype(f32),
        "g2": params["g2"].astype(f32), "be2": params["be2"].astype(f32),
    }


def _vmem_cap_bytes():
    # Generation-aware ceiling: 128 MiB on v5e/v6e, 64 MiB on v7x; leave
    # headroom for Mosaic-internal scratch instead of claiming all of it.
    try:
        cap = int(getattr(pltpu.get_tpu_info(), "vmem_capacity_bytes", 64 << 20))
    except Exception:
        cap = 64 << 20
    return max(32 << 20, cap - (8 << 20))


def _vmem_limit_bytes(seq, d_model, d_ff, n_heads, tq, attn_bytes, sim_bytes):
    f32, bf16 = 4, 2
    dk = d_model // n_heads
    # Pallas double-buffers the pipelined input/output blocks.
    blocks = 2 * (tq * d_model * f32                       # xq tile
                  + seq * d_model * bf16                   # xf rows (bf16)
                  + tq * d_model * f32                     # out tile
                  + n_heads * tq * seq * (attn_bytes + sim_bytes))
    weights = 2 * ((4 * d_model * d_model + 2 * d_model * d_ff) * bf16
                   + (3 * n_heads * dk + 8 * d_model + d_ff) * f32)
    scratch = 2 * n_heads * seq * dk * bf16                # K/V cache
    # live temporaries: one head's scores (few f32 copies) + FFN intermediate
    live = (4 * tq * seq + tq * d_ff + 4 * tq * d_model) * f32
    est = blocks + weights + scratch + live + (8 << 20)
    return int(min(_vmem_cap_bytes(), max(32 << 20, est)))


def encoder_layer(x, params, n_heads, *, q_tile=128, attn_dtype=jnp.bfloat16,
                  sim_dtype=None, return_sim=True):
    B, L, D = x.shape
    if D % n_heads != 0:
        raise ValueError("d_model must be divisible by n_heads")
    dk = D // n_heads
    TQ = L if L <= q_tile else q_tile
    if L % TQ != 0:
        raise ValueError("seq_len must be divisible by the query tile")
    NQ = L // TQ
    if NQ > 1 and TQ % 8 != 0:
        raise ValueError("query tile must be a multiple of 8 when tiling")
    sim_dtype = attn_dtype if sim_dtype is None else sim_dtype

    kp = _prepare_kernel_params(params, D, n_heads)
    d_ff = kp["w1"].shape[1]

    def wspec(shape):  # grid-invariant weight/bias block
        nd = len(shape)
        return pl.BlockSpec(shape, lambda b, qi, _nd=nd: (0,) * _nd)

    in_specs = [
        pl.BlockSpec((1, TQ, D), lambda b, qi: (b, qi, 0)),   # query-row tile (f32)
        pl.BlockSpec((1, L, D), lambda b, qi: (b, 0, 0)),     # full rows for K/V (bf16)
    ] + [wspec(kp[name].shape) for name in _KPARAMS]

    out_shape = [jax.ShapeDtypeStruct((B, L, D), jnp.float32),
                 jax.ShapeDtypeStruct((B, n_heads, L, L), attn_dtype)]
    out_specs = [pl.BlockSpec((1, TQ, D), lambda b, qi: (b, qi, 0)),
                 pl.BlockSpec((1, n_heads, TQ, L), lambda b, qi: (b, 0, qi, 0))]
    if return_sim:
        out_shape.append(jax.ShapeDtypeStruct((B, n_heads, L, L), sim_dtype))
        out_specs.append(pl.BlockSpec((1, n_heads, TQ, L), lambda b, qi: (b, 0, qi, 0)))

    scratch_shapes = [pltpu.VMEM((n_heads, L, dk), jnp.bfloat16),   # K cache
                      pltpu.VMEM((n_heads, L, dk), jnp.bfloat16)]   # V cache

    fn = pl.pallas_call(
        partial(encoder_layer_kernel, n_heads=n_heads, write_sim=return_sim),
        grid=(B, NQ),
        in_specs=in_specs,
        out_specs=tuple(out_specs),
        out_shape=tuple(out_shape),
        scratch_shapes=scratch_shapes,
        compiler_params=pltpu.CompilerParams(
            # qi must stay "arbitrary": the K/V VMEM cache written at qi == 0
            # is reused by later query tiles of the same batch element.
            # TODO(synk): with B == 1 and NQ > 1 one v7x TensorCore idles.
            dimension_semantics=("parallel", "arbitrary"),
            vmem_limit_bytes=_vmem_limit_bytes(
                L, D, d_ff, n_heads, TQ,
                jnp.dtype(attn_dtype).itemsize,
                jnp.dtype(sim_dtype).itemsize if return_sim else 0),
        ),
    )
    # residual/LayerNorm stream stays f32; K/V source is consumed only as a
    # bf16 MXU operand, so ship it as bf16 (half the DMA bytes).
    args = [x.astype(jnp.float32), x.astype(jnp.bfloat16)] \
        + [kp[name] for name in _KPARAMS]
    return fn(*args)


def encoder_layer_ref(x, p, n_heads):
    """Pure-JAX f32 reference mirroring the PyTorch forward (eval mode)."""
    B, L, D = x.shape
    dk = D // n_heads
    q = x @ p["wq_t"] + p["bq"]
    k = x @ p["wk_t"] + p["bk"]
    v = x @ p["wv_t"] + p["bv"]
    qh = q.reshape(B, L, n_heads, dk).transpose(0, 2, 1, 3)
    kh = k.reshape(B, L, n_heads, dk).transpose(0, 2, 1, 3)
    vh = v.reshape(B, L, n_heads, dk).transpose(0, 2, 1, 3)
    sim = jnp.einsum("bhqd,bhkd->bhqk", qh, kh) / math.sqrt(dk)
    attn = jax.nn.softmax(sim, axis=-1)
    new_x = jnp.einsum("bhqk,bhkd->bhqd", attn, vh)
    new_x = new_x.transpose(0, 2, 1, 3).reshape(B, L, D)
    new_x = new_x @ p["wo_t"] + p["bo"]
    x1 = _layer_norm(x + new_x, p["g1"], p["be1"])
    y = jnp.maximum(x1 @ p["w1_t"] + p["b1"], 0.0)
    y = y @ p["w2_t"] + p["b2"]
    out = _layer_norm(x1 + y, p["g2"], p["be2"])
    return out, attn, sim


def make_params(key, d_model, d_ff):
    ks = jax.random.split(key, 16)
    n = lambda k, shape, s=0.1: jax.random.normal(k, shape, jnp.float32) * s
    return {
        "wq_t": n(ks[0], (d_model, d_model)), "bq": n(ks[1], (1, d_model), 0.02),
        "wk_t": n(ks[2], (d_model, d_model)), "bk": n(ks[3], (1, d_model), 0.02),
        "wv_t": n(ks[4], (d_model, d_model)), "bv": n(ks[5], (1, d_model), 0.02),
        "wo_t": n(ks[6], (d_model, d_model)), "bo": n(ks[7], (1, d_model), 0.02),
        # conv1: (d_ff, d_model, 1) -> stored transposed (d_model, d_ff)
        "w1_t": n(ks[8], (d_model, d_ff)), "b1": n(ks[9], (1, d_ff), 0.02),
        # conv2: (d_model, d_ff, 1) -> stored transposed (d_ff, d_model)
        "w2_t": n(ks[10], (d_ff, d_model)), "b2": n(ks[11], (1, d_model), 0.02),
        "g1": 1.0 + n(ks[12], (1, d_model), 0.05), "be1": n(ks[13], (1, d_model), 0.05),
        "g2": 1.0 + n(ks[14], (1, d_model), 0.05), "be2": n(ks[15], (1, d_model), 0.05),
    }


if __name__ == "__main__":
    B, L, D, H = 2, 16, 64, 4
    d_ff = 4 * D

    key = jax.random.PRNGKey(0)
    kx, kparam = jax.random.split(key)
    x = jax.random.normal(kx, (B, L, D), jnp.float32)
    params = make_params(kparam, D, d_ff)

    out_r, attn_r, sim_r = encoder_layer_ref(x, params, H)
    f32 = jnp.float32

    # (1) single query tile, bf16 attn/sim outputs (new default)
    out1, attn1, sim1 = encoder_layer(x, params, H, q_tile=L)
    # (2) tiled queries (K/V cache reused across tiles), f32 attn/sim outputs
    out2, attn2, sim2 = encoder_layer(x, params, H, q_tile=8, attn_dtype=f32)
    # (3) tiled queries, sim output skipped entirely
    out3, attn3 = encoder_layer(x, params, H, q_tile=8, return_sim=False)
    jax.block_until_ready((out1, attn1, sim1, out2, attn2, sim2, out3, attn3))

    # bf16 MXU operands (and bf16 attn/sim storage in (1)/(3)) => relaxed tols.
    assert jnp.allclose(sim1.astype(f32), sim_r, atol=3e-2, rtol=3e-2), "sim mismatch"
    assert jnp.allclose(attn1.astype(f32), attn_r, atol=3e-2, rtol=3e-2), "attn mismatch"
    assert jnp.allclose(out1, out_r, atol=5e-2, rtol=5e-2), "out mismatch"

    assert jnp.allclose(sim2, sim_r, atol=2e-2, rtol=2e-2), "sim mismatch"
    assert jnp.allclose(attn2, attn_r, atol=2e-2, rtol=2e-2), "attn mismatch"
    assert jnp.allclose(out2, out_r, atol=5e-2, rtol=5e-2), "out mismatch"

    assert jnp.allclose(attn3.astype(f32), attn_r, atol=3e-2, rtol=3e-2), "attn mismatch"
    assert jnp.allclose(out3, out_r, atol=5e-2, rtol=5e-2), "out mismatch"

    print("KERNEL_OK")
</pallas_src>

<mosaic_0001>
module attributes {stable_mosaic.version = 11 : i64} {
  func.func @encoder_layer_kernel(%arg0: i32, %arg1: i32, %arg2: memref<1x16x64xf32, #tpu.memory_space<vmem>>, %arg3: memref<1x16x64xbf16, #tpu.memory_space<vmem>>, %arg4: memref<4x64x16xbf16, #tpu.memory_space<vmem>>, %arg5: memref<4x1x16xf32, #tpu.memory_space<vmem>>, %arg6: memref<4x64x16xbf16, #tpu.memory_space<vmem>>, %arg7: memref<4x1x16xf32, #tpu.memory_space<vmem>>, %arg8: memref<4x64x16xbf16, #tpu.memory_space<vmem>>, %arg9: memref<4x1x16xf32, #tpu.memory_space<vmem>>, %arg10: memref<4x16x64xbf16, #tpu.memory_space<vmem>>, %arg11: memref<1x64xf32, #tpu.memory_space<vmem>>, %arg12: memref<1x64xf32, #tpu.memory_space<vmem>>, %arg13: memref<1x64xf32, #tpu.memory_space<vmem>>, %arg14: memref<64x256xbf16, #tpu.memory_space<vmem>>, %arg15: memref<1x256xf32, #tpu.memory_space<vmem>>, %arg16: memref<256x64xbf16, #tpu.memory_space<vmem>>, %arg17: memref<1x64xf32, #tpu.memory_space<vmem>>, %arg18: memref<1x64xf32, #tpu.memory_space<vmem>>, %arg19: memref<1x64xf32, #tpu.memory_space<vmem>>, %arg20: memref<1x16x64xf32, #tpu.memory_space<vmem>>, %arg21: memref<1x4x16x16xbf16, #tpu.memory_space<vmem>>, %arg22: memref<1x4x16x16xbf16, #tpu.memory_space<vmem>>, %arg23: memref<4x16x16xbf16, #tpu.memory_space<vmem>>, %arg24: memref<4x16x16xbf16, #tpu.memory_space<vmem>>) attributes {dimension_semantics = [#tpu.dimension_semantics<parallel>, #tpu.dimension_semantics<arbitrary>], iteration_bounds = array<i64: 2, 1>, scalar_prefetch = 0 : i64, scratch_operands = 2 : i64, tpu.core_type = #tpu.core_type<tc>, window_params = [{transform_indices = @transform_0, window_bounds = array<i64: 1, 16, 64>}, {transform_indices = @transform_1, window_bounds = array<i64: 1, 16, 64>}, {pipeline_mode = #tpu.pipeline_mode<synchronous>, transform_indices = @transform_2, window_bounds = array<i64: 4, 64, 16>}, {pipeline_mode = #tpu.pipeline_mode<synchronous>, transform_indices = @transform_3, window_bounds = array<i64: 4, 1, 16>}, {pipeline_mode = #tpu.pipeline_mode<synchronous>, transform_indices = @transform_4, window_bounds = array<i64: 4, 64, 16>}, {pipeline_mode = #tpu.pipeline_mode<synchronous>, transform_indices = @transform_5, window_bounds = array<i64: 4, 1, 16>}, {pipeline_mode = #tpu.pipeline_mode<synchronous>, transform_indices = @transform_6, window_bounds = array<i64: 4, 64, 16>}, {pipeline_mode = #tpu.pipeline_mode<synchronous>, transform_indices = @transform_7, window_bounds = array<i64: 4, 1, 16>}, {pipeline_mode = #tpu.pipeline_mode<synchronous>, transform_indices = @transform_8, window_bounds = array<i64: 4, 16, 64>}, {pipeline_mode = #tpu.pipeline_mode<synchronous>, transform_indices = @transform_9, window_bounds = array<i64: 1, 64>}, {pipeline_mode = #tpu.pipeline_mode<synchronous>, transform_indices = @transform_10, window_bounds = array<i64: 1, 64>}, {pipeline_mode = #tpu.pipeline_mode<synchronous>, transform_indices = @transform_11, window_bounds = array<i64: 1, 64>}, {pipeline_mode = #tpu.pipeline_mode<synchronous>, transform_indices = @transform_12, window_bounds = array<i64: 64, 256>}, {pipeline_mode = #tpu.pipeline_mode<synchronous>, transform_indices = @transform_13, window_bounds = array<i64: 1, 256>}, {pipeline_mode = #tpu.pipeline_mode<synchronous>, transform_indices = @transform_14, window_bounds = array<i64: 256, 64>}, {pipeline_mode = #tpu.pipeline_mode<synchronous>, transform_indices = @transform_15, window_bounds = array<i64: 1, 64>}, {pipeline_mode = #tpu.pipeline_mode<synchronous>, transform_indices = @transform_16, window_bounds = array<i64: 1, 64>}, {pipeline_mode = #tpu.pipeline_mode<synchronous>, transform_indices = @transform_17, window_bounds = array<i64: 1, 64>}, {transform_indices = @transform_18, window_bounds = array<i64: 1, 16, 64>}, {transform_indices = @transform_19, window_bounds = array<i64: 1, 4, 16, 16>}, {transform_indices = @transform_20, window_bounds = array<i64: 1, 4, 16, 16>}]} {
    %c0 = arith.constant 0 : index
    %c0_0 = arith.constant 0 : index
    %c0_1 = arith.constant 0 : index
    %0 = vector.load %arg2[%c0, %c0_0, %c0_1] : memref<1x16x64xf32, #tpu.memory_space<vmem>>, vector<1x16x64xf32>
    %1 = vector.shape_cast %0 : vector<1x16x64xf32> to vector<16x64xf32>
    %c0_i32 = arith.constant 0 : i32
    %2 = arith.cmpi eq, %arg1, %c0_i32 : i32
    %3 = arith.extui %2 : i1 to i32
    %c0_i32_2 = arith.constant 0 : i32
    %4 = arith.cmpi ne, %3, %c0_i32_2 : i32
    scf.if %4 {
      %c0_154 = arith.constant 0 : index
      %c0_155 = arith.constant 0 : index
      %c0_156 = arith.constant 0 : index
      %237 = vector.load %arg3[%c0_154, %c0_155, %c0_156] : memref<1x16x64xbf16, #tpu.memory_space<vmem>>, vector<1x16x64xbf16>
      %238 = vector.shape_cast %237 : vector<1x16x64xbf16> to vector<16x64xbf16>
      %c0_157 = arith.constant 0 : index
      %c0_158 = arith.constant 0 : index
      %c0_159 = arith.constant 0 : index
      %239 = vector.load %arg6[%c0_157, %c0_158, %c0_159] : memref<4x64x16xbf16, #tpu.memory_space<vmem>>, vector<1x64x16xbf16>
      %240 = vector.shape_cast %239 : vector<1x64x16xbf16> to vector<64x16xbf16>
      %cst_160 = arith.constant dense<0.000000e+00> : vector<16x16xf32>
      %241 = tpu.matmul %238, %240, %cst_160 {dimension_numbers = #tpu.dot_dimension_numbers<[1], [0], [0], [1], [0, 0, 1, 1], [], []>} : vector<16x64xbf16>, vector<64x16xbf16>, vector<16x16xf32> -> vector<16x16xf32>
      %c0_161 = arith.constant 0 : index
      %c0_162 = arith.constant 0 : index
      %c0_163 = arith.constant 0 : index
      %242 = vector.load %arg7[%c0_161, %c0_162, %c0_163] : memref<4x1x16xf32, #tpu.memory_space<vmem>>, vector<1x1x16xf32>
      %243 = vector.shape_cast %242 : vector<1x1x16xf32> to vector<1x16xf32>
      %244 = vector.broadcast %243 : vector<1x16xf32> to vector<16x16xf32>
      %245 = arith.addf %241, %244 : vector<16x16xf32>
      %c0_164 = arith.constant 0 : index
      %c0_165 = arith.constant 0 : index
      %c0_166 = arith.constant 0 : index
      %246 = vector.load %arg8[%c0_164, %c0_165, %c0_166] : memref<4x64x16xbf16, #tpu.memory_space<vmem>>, vector<1x64x16xbf16>
      %247 = vector.shape_cast %246 : vector<1x64x16xbf16> to vector<64x16xbf16>
      %cst_167 = arith.constant dense<0.000000e+00> : vector<16x16xf32>
      %248 = tpu.matmul %238, %247, %cst_167 {dimension_numbers = #tpu.dot_dimension_numbers<[1], [0], [0], [1], [0, 0, 1, 1], [], []>} : vector<16x64xbf16>, vector<64x16xbf16>, vector<16x16xf32> -> vector<16x16xf32>
      %c0_168 = arith.constant 0 : index
      %c0_169 = arith.constant 0 : index
      %c0_170 = arith.constant 0 : index
      %249 = vector.load %arg9[%c0_168, %c0_169, %c0_170] : memref<4x1x16xf32, #tpu.memory_space<vmem>>, vector<1x1x16xf32>
      %250 = vector.shape_cast %249 : vector<1x1x16xf32> to vector<1x16xf32>
      %251 = vector.broadcast %250 : vector<1x16xf32> to vector<16x16xf32>
      %252 = arith.addf %248, %251 : vector<16x16xf32>
      %253 = arith.truncf %245 : vector<16x16xf32> to vector<16x16xbf16>
      %c0_171 = arith.constant 0 : index
      %c0_172 = arith.constant 0 : index
      %c0_173 = arith.constant 0 : index
      %254 = vector.load %arg23[%c0_171, %c0_172, %c0_173] : memref<4x16x16xbf16, #tpu.memory_space<vmem>>, vector<1x16x16xbf16>
      %255 = vector.shape_cast %254 : vector<1x16x16xbf16> to vector<16x16xbf16>
      %256 = vector.shape_cast %253 : vector<16x16xbf16> to vector<1x16x16xbf16>
      tpu.vector_store %arg23[%c0_171, %c0_172, %c0_173], %256 {strides = array<i32>} : memref<4x16x16xbf16, #tpu.memory_space<vmem>>, vector<1x16x16xbf16>,
      %257 = arith.truncf %252 : vector<16x16xf32> to vector<16x16xbf16>
      %c0_174 = arith.constant 0 : index
      %c0_175 = arith.constant 0 : index
      %c0_176 = arith.constant 0 : index
      %258 = vector.load %arg24[%c0_174, %c0_175, %c0_176] : memref<4x16x16xbf16, #tpu.memory_space<vmem>>, vector<1x16x16xbf16>
      %259 = vector.shape_cast %258 : vector<1x16x16xbf16> to vector<16x16xbf16>
      %260 = vector.shape_cast %257 : vector<16x16xbf16> to vector<1x16x16xbf16>
      tpu.vector_store %arg24[%c0_174, %c0_175, %c0_176], %260 {strides = array<i32>} : memref<4x16x16xbf16, #tpu.memory_space<vmem>>, vector<1x16x16xbf16>,
      %c1_177 = arith.constant 1 : index
      %c0_178 = arith.constant 0 : index
      %c0_179 = arith.constant 0 : index
      %261 = vector.load %arg6[%c1_177, %c0_178, %c0_179] : memref<4x64x16xbf16, #tpu.memory_space<vmem>>, vector<1x64x16xbf16>
      %262 = vector.shape_cast %261 : vector<1x64x16xbf16> to vector<64x16xbf16>
      %cst_180 = arith.constant dense<0.000000e+00> : vector<16x16xf32>
      %263 = tpu.matmul %238, %262, %cst_180 {dimension_numbers = #tpu.dot_dimension_numbers<[1], [0], [0], [1], [0, 0, 1, 1], [], []>} : vector<16x64xbf16>, vector<64x16xbf16>, vector<16x16xf32> -> vector<16x16xf32>
      %c1_181 = arith.constant 1 : index
      %c0_182 = arith.constant 0 : index
      %c0_183 = arith.constant 0 : index
      %264 = vector.load %arg7[%c1_181, %c0_182, %c0_183] : memref<4x1x16xf32, #tpu.memory_space<vmem>>, vector<1x1x16xf32>
      %265 = vector.shape_cast %264 : vector<1x1x16xf32> to vector<1x16xf32>
      %266 = vector.broadcast %265 : vector<1x16xf32> to vector<16x16xf32>
      %267 = arith.addf %263, %266 : vector<16x16xf32>
      %c1_184 = arith.constant 1 : index
      %c0_185 = arith.constant 0 : index
      %c0_186 = arith.constant 0 : index
      %268 = vector.load %arg8[%c1_184, %c0_185, %c0_186] : memref<4x64x16xbf16, #tpu.memory_space<vmem>>, vector<1x64x16xbf16>
      %269 = vector.shape_cast %268 : vector<1x64x16xbf16> to vector<64x16xbf16>
      %cst_187 = arith.constant dense<0.000000e+00> : vector<16x16xf32>
      %270 = tpu.matmul %238, %269, %cst_187 {dimension_numbers = #tpu.dot_dimension_numbers<[1], [0], [0], [1], [0, 0, 1, 1], [], []>} : vector<16x64xbf16>, vector<64x16xbf16>, vector<16x16xf32> -> vector<16x16xf32>
      %c1_188 = arith.constant 1 : index
      %c0_189 = arith.constant 0 : index
      %c0_190 = arith.constant 0 : index
      %271 = vector.load %arg9[%c1_188, %c0_189, %c0_190] : memref<4x1x16xf32, #tpu.memory_space<vmem>>, vector<1x1x16xf32>
      %272 = vector.shape_cast %271 : vector<1x1x16xf32> to vector<1x16xf32>
      %273 = vector.broadcast %272 : vector<1x16xf32> to vector<16x16xf32>
      %274 = arith.addf %270, %273 : vector<16x16xf32>
      %275 = arith.truncf %267 : vector<16x16xf32> to vector<16x16xbf16>
      %c1_191 = arith.constant 1 : index
      %c0_192 = arith.constant 0 : index
      %c0_193 = arith.constant 0 : index
      %276 = vector.load %arg23[%c1_191, %c0_192, %c0_193] : memref<4x16x16xbf16, #tpu.memory_space<vmem>>, vector<1x16x16xbf16>
      %277 = vector.shape_cast %276 : vector<1x16x16xbf16> to vector<16x16xbf16>
      %278 = vector.shape_cast %275 : vector<16x16xbf16> to vector<1x16x16xbf16>
      tpu.vector_store %arg23[%c1_191, %c0_192, %c0_193], %278 {strides = array<i32>} : memref<4x16x16xbf16, #tpu.memory_space<vmem>>, vector<1x16x16xbf16>,
      %279 = arith.truncf %274 : vector<16x16xf32> to vector<16x16xbf16>
      %c1_194 = arith.constant 1 : index
      %c0_195 = arith.constant 0 : index
      %c0_196 = arith.constant 0 : index
      %280 = vector.load %arg24[%c1_194, %c0_195, %c0_196] : memref<4x16x16xbf16, #tpu.memory_space<vmem>>, vector<1x16x16xbf16>
      %281 = vector.shape_cast %280 : vector<1x16x16xbf16> to vector<16x16xbf16>
      %282 = vector.shape_cast %279 : vector<16x16xbf16> to vector<1x16x16xbf16>
      tpu.vector_store %arg24[%c1_194, %c0_195, %c0_196], %282 {strides = array<i32>} : memref<4x16x16xbf16, #tpu.memory_space<vmem>>, vector<1x16x16xbf16>,
      %c2_197 = arith.constant 2 : index
      %c0_198 = arith.constant 0 : index
      %c0_199 = arith.constant 0 : index
      %283 = vector.load %arg6[%c2_197, %c0_198, %c0_199] : memref<4x64x16xbf16, #tpu.memory_space<vmem>>, vector<1x64x16xbf16>
      %284 = vector.shape_cast %283 : vector<1x64x16xbf16> to vector<64x16xbf16>
      %cst_200 = arith.constant dense<0.000000e+00> : vector<16x16xf32>
      %285 = tpu.matmul %238, %284, %cst_200 {dimension_numbers = #tpu.dot_dimension_numbers<[1], [0], [0], [1], [0, 0, 1, 1], [], []>} : vector<16x64xbf16>, vector<64x16xbf16>, vector<16x16xf32> -> vector<16x16xf32>
      %c2_201 = arith.constant 2 : index
      %c0_202 = arith.constant 0 : index
      %c0_203 = arith.constant 0 : index
      %286 = vector.load %arg7[%c2_201, %c0_202, %c0_203] : memref<4x1x16xf32, #tpu.memory_space<vmem>>, vector<1x1x16xf32>
      %287 = vector.shape_cast %286 : vector<1x1x16xf32> to vector<1x16xf32>
      %288 = vector.broadcast %287 : vector<1x16xf32> to vector<16x16xf32>
      %289 = arith.addf %285, %288 : vector<16x16xf32>
      %c2_204 = arith.constant 2 : index
      %c0_205 = arith.constant 0 : index
      %c0_206 = arith.constant 0 : index
      %290 = vector.load %arg8[%c2_204, %c0_205, %c0_206] : memref<4x64x16xbf16, #tpu.memory_space<vmem>>, vector<1x64x16xbf16>
      %291 = vector.shape_cast %290 : vector<1x64x16xbf16> to vector<64x16xbf16>
      %cst_207 = arith.constant dense<0.000000e+00> : vector<16x16xf32>
      %292 = tpu.matmul %238, %291, %cst_207 {dimension_numbers = #tpu.dot_dimension_numbers<[1], [0], [0], [1], [0, 0, 1, 1], [], []>} : vector<16x64xbf16>, vector<64x16xbf16>, vector<16x16xf32> -> vector<16x16xf32>
      %c2_208 = arith.constant 2 : index
      %c0_209 = arith.constant 0 : index
      %c0_210 = arith.constant 0 : index
      %293 = vector.load %arg9[%c2_208, %c0_209, %c0_210] : memref<4x1x16xf32, #tpu.memory_space<vmem>>, vector<1x1x16xf32>
      %294 = vector.shape_cast %293 : vector<1x1x16xf32> to vector<1x16xf32>
      %295 = vector.broadcast %294 : vector<1x16xf32> to vector<16x16xf32>
      %296 = arith.addf %292, %295 : vector<16x16xf32>
      %297 = arith.truncf %289 : vector<16x16xf32> to vector<16x16xbf16>
      %c2_211 = arith.constant 2 : index
      %c0_212 = arith.constant 0 : index
      %c0_213 = arith.constant 0 : index
      %298 = vector.load %arg23[%c2_211, %c0_212, %c0_213] : memref<4x16x16xbf16, #tpu.memory_space<vmem>>, vector<1x16x16xbf16>
      %299 = vector.shape_cast %298 : vector<1x16x16xbf16> to vector<16x16xbf16>
      %300 = vector.shape_cast %297 : vector<16x16xbf16> to vector<1x16x16xbf16>
      tpu.vector_store %arg23[%c2_211, %c0_212, %c0_213], %300 {strides = array<i32>} : memref<4x16x16xbf16, #tpu.memory_space<vmem>>, vector<1x16x16xbf16>,
      %301 = arith.truncf %296 : vector<16x16xf32> to vector<16x16xbf16>
      %c2_214 = arith.constant 2 : index
      %c0_215 = arith.constant 0 : index
      %c0_216 = arith.constant 0 : index
      %302 = vector.load %arg24[%c2_214, %c0_215, %c0_216] : memref<4x16x16xbf16, #tpu.memory_space<vmem>>, vector<1x16x16xbf16>
      %303 = vector.shape_cast %302 : vector<1x16x16xbf16> to vector<16x16xbf16>
      %304 = vector.shape_cast %301 : vector<16x16xbf16> to vector<1x16x16xbf16>
      tpu.vector_store %arg24[%c2_214, %c0_215, %c0_216], %304 {strides = array<i32>} : memref<4x16x16xbf16, #tpu.memory_space<vmem>>, vector<1x16x16xbf16>,
      %c3_217 = arith.constant 3 : index
      %c0_218 = arith.constant 0 : index
      %c0_219 = arith.constant 0 : index
      %305 = vector.load %arg6[%c3_217, %c0_218, %c0_219] : memref<4x64x16xbf16, #tpu.memory_space<vmem>>, vector<1x64x16xbf16>
      %306 = vector.shape_cast %305 : vector<1x64x16xbf16> to vector<64x16xbf16>
      %cst_220 = arith.constant dense<0.000000e+00> : vector<16x16xf32>
      %307 = tpu.matmul %238, %306, %cst_220 {dimension_numbers = #tpu.dot_dimension_numbers<[1], [0], [0], [1], [0, 0, 1, 1], [], []>} : vector<16x64xbf16>, vector<64x16xbf16>, vector<16x16xf32> -> vector<16x16xf32>
      %c3_221 = arith.constant 3 : index
      %c0_222 = arith.constant 0 : index
      %c0_223 = arith.constant 0 : index
      %308 = vector.load %arg7[%c3_221, %c0_222, %c0_223] : memref<4x1x16xf32, #tpu.memory_space<vmem>>, vector<1x1x16xf32>
      %309 = vector.shape_cast %308 : vector<1x1x16xf32> to vector<1x16xf32>
      %310 = vector.broadcast %309 : vector<1x16xf32> to vector<16x16xf32>
      %311 = arith.addf %307, %310 : vector<16x16xf32>
      %c3_224 = arith.constant 3 : index
      %c0_225 = arith.constant 0 : index
      %c0_226 = arith.constant 0 : index
      %312 = vector.load %arg8[%c3_224, %c0_225, %c0_226] : memref<4x64x16xbf16, #tpu.memory_space<vmem>>, vector<1x64x16xbf16>
      %313 = vector.shape_cast %312 : vector<1x64x16xbf16> to vector<64x16xbf16>
      %cst_227 = arith.constant dense<0.000000e+00> : vector<16x16xf32>
      %314 = tpu.matmul %238, %313, %cst_227 {dimension_numbers = #tpu.dot_dimension_numbers<[1], [0], [0], [1], [0, 0, 1, 1], [], []>} : vector<16x64xbf16>, vector<64x16xbf16>, vector<16x16xf32> -> vector<16x16xf32>
      %c3_228 = arith.constant 3 : index
      %c0_229 = arith.constant 0 : index
      %c0_230 = arith.constant 0 : index
      %315 = vector.load %arg9[%c3_228, %c0_229, %c0_230] : memref<4x1x16xf32, #tpu.memory_space<vmem>>, vector<1x1x16xf32>
      %316 = vector.shape_cast %315 : vector<1x1x16xf32> to vector<1x16xf32>
      %317 = vector.broadcast %316 : vector<1x16xf32> to vector<16x16xf32>
      %318 = arith.addf %314, %317 : vector<16x16xf32>
      %319 = arith.truncf %311 : vector<16x16xf32> to vector<16x16xbf16>
      %c3_231 = arith.constant 3 : index
      %c0_232 = arith.constant 0 : index
      %c0_233 = arith.constant 0 : index
      %320 = vector.load %arg23[%c3_231, %c0_232, %c0_233] : memref<4x16x16xbf16, #tpu.memory_space<vmem>>, vector<1x16x16xbf16>
      %321 = vector.shape_cast %320 : vector<1x16x16xbf16> to vector<16x16xbf16>
      %322 = vector.shape_cast %319 : vector<16x16xbf16> to vector<1x16x16xbf16>
      tpu.vector_store %arg23[%c3_231, %c0_232, %c0_233], %322 {strides = array<i32>} : memref<4x16x16xbf16, #tpu.memory_space<vmem>>, vector<1x16x16xbf16>,
      %323 = arith.truncf %318 : vector<16x16xf32> to vector<16x16xbf16>
      %c3_234 = arith.constant 3 : index
      %c0_235 = arith.constant 0 : index
      %c0_236 = arith.constant 0 : index
      %324 = vector.load %arg24[%c3_234, %c0_235, %c0_236] : memref<4x16x16xbf16, #tpu.memory_space<vmem>>, vector<1x16x16xbf16>
      %325 = vector.shape_cast %324 : vector<1x16x16xbf16> to vector<16x16xbf16>
      %326 = vector.shape_cast %323 : vector<16x16xbf16> to vector<1x16x16xbf16>
      tpu.vector_store %arg24[%c3_234, %c0_235, %c0_236], %326 {strides = array<i32>} : memref<4x16x16xbf16, #tpu.memory_space<vmem>>, vector<1x16x16xbf16>,
    } else {
    }
    %5 = arith.truncf %1 : vector<16x64xf32> to vector<16x64xbf16>
    %cst = arith.constant 0.000000e+00 : f32
    %6 = vector.broadcast %cst : f32 to vector<16x64xf32>
    %c0_3 = arith.constant 0 : index
    %c0_4 = arith.constant 0 : index
    %c0_5 = arith.constant 0 : index
    %7 = vector.load %arg4[%c0_3, %c0_4, %c0_5] : memref<4x64x16xbf16, #tpu.memory_space<vmem>>, vector<1x64x16xbf16>
    %8 = vector.shape_cast %7 : vector<1x64x16xbf16> to vector<64x16xbf16>
    %cst_6 = arith.constant dense<0.000000e+00> : vector<16x16xf32>
    %9 = tpu.matmul %5, %8, %cst_6 {dimension_numbers = #tpu.dot_dimension_numbers<[1], [0], [0], [1], [0, 0, 1, 1], [], []>} : vector<16x64xbf16>, vector<64x16xbf16>, vector<16x16xf32> -> vector<16x16xf32>
    %c0_7 = arith.constant 0 : index
    %c0_8 = arith.constant 0 : index
    %c0_9 = arith.constant 0 : index
    %10 = vector.load %arg5[%c0_7, %c0_8, %c0_9] : memref<4x1x16xf32, #tpu.memory_space<vmem>>, vector<1x1x16xf32>
    %11 = vector.shape_cast %10 : vector<1x1x16xf32> to vector<1x16xf32>
    %12 = vector.broadcast %11 : vector<1x16xf32> to vector<16x16xf32>
    %13 = arith.addf %9, %12 : vector<16x16xf32>
    %c0_10 = arith.constant 0 : index
    %c0_11 = arith.constant 0 : index
    %c0_12 = arith.constant 0 : index
    %14 = vector.load %arg23[%c0_10, %c0_11, %c0_12] : memref<4x16x16xbf16, #tpu.memory_space<vmem>>, vector<1x16x16xbf16>
    %15 = vector.shape_cast %14 : vector<1x16x16xbf16> to vector<16x16xbf16>
    %c0_13 = arith.constant 0 : index
    %c0_14 = arith.constant 0 : index
    %c0_15 = arith.constant 0 : index
    %16 = vector.load %arg24[%c0_13, %c0_14, %c0_15] : memref<4x16x16xbf16, #tpu.memory_space<vmem>>, vector<1x16x16xbf16>
    %17 = vector.shape_cast %16 : vector<1x16x16xbf16> to vector<16x16xbf16>
    %18 = arith.truncf %13 : vector<16x16xf32> to vector<16x16xbf16>
    %cst_16 = arith.constant dense<0.000000e+00> : vector<16x16xf32>
    %19 = tpu.matmul %18, %15, %cst_16 {dimension_numbers = #tpu.dot_dimension_numbers<[1], [1], [0], [0], [0, 0, 1, 0], [], []>} : vector<16x16xbf16>, vector<16x16xbf16>, vector<16x16xf32> -> vector<16x16xf32>
    %cst_17 = arith.constant 2.500000e-01 : f32
    %20 = vector.broadcast %cst_17 : f32 to vector<16x16xf32>
    %21 = arith.mulf %19, %20 : vector<16x16xf32>
    %22 = arith.truncf %21 : vector<16x16xf32> to vector<16x16xbf16>
    %c0_18 = arith.constant 0 : index
    %c0_19 = arith.constant 0 : index
    %c0_20 = arith.constant 0 : index
    %c0_21 = arith.constant 0 : index
    %23 = vector.load %arg22[%c0_18, %c0_19, %c0_20, %c0_21] : memref<1x4x16x16xbf16, #tpu.memory_space<vmem>>, vector<1x1x16x16xbf16>
    %24 = vector.shape_cast %23 : vector<1x1x16x16xbf16> to vector<16x16xbf16>
    %25 = vector.shape_cast %22 : vector<16x16xbf16> to vector<1x1x16x16xbf16>
    tpu.vector_store %arg22[%c0_18, %c0_19, %c0_20, %c0_21], %25 {strides = array<i32>} : memref<1x4x16x16xbf16, #tpu.memory_space<vmem>>, vector<1x1x16x16xbf16>,
    %cst_22 = arith.constant dense<0xFF800000> : vector<16xf32>
    %26 = vector.multi_reduction <maximumf>, %21, %cst_22 [1] : vector<16x16xf32> to vector<16xf32>
    %27 = vector.shape_cast %26 : vector<16xf32> to vector<16x1xf32>
    %28 = vector.broadcast %27 : vector<16x1xf32> to vector<16x16xf32>
    %29 = arith.subf %21, %28 : vector<16x16xf32>
    %30 = math.exp %29 : vector<16x16xf32>
    %cst_23 = arith.constant dense<0.000000e+00> : vector<16xf32>
    %31 = vector.multi_reduction <add>, %30, %cst_23 [1] : vector<16x16xf32> to vector<16xf32>
    %32 = vector.shape_cast %31 : vector<16xf32> to vector<16x1xf32>
    %33 = tpu.reciprocal %32 {approx = true} : vector<16x1xf32> -> vector<16x1xf32>
    %34 = vector.broadcast %33 : vector<16x1xf32> to vector<16x16xf32>
    %35 = arith.mulf %30, %34 : vector<16x16xf32>
    %36 = arith.truncf %35 : vector<16x16xf32> to vector<16x16xbf16>
    %c0_24 = arith.constant 0 : index
    %c0_25 = arith.constant 0 : index
    %c0_26 = arith.constant 0 : index
    %c0_27 = arith.constant 0 : index
    %37 = vector.load %arg21[%c0_24, %c0_25, %c0_26, %c0_27] : memref<1x4x16x16xbf16, #tpu.memory_space<vmem>>, vector<1x1x16x16xbf16>
    %38 = vector.shape_cast %37 : vector<1x1x16x16xbf16> to vector<16x16xbf16>
    %39 = vector.shape_cast %36 : vector<16x16xbf16> to vector<1x1x16x16xbf16>
    tpu.vector_store %arg21[%c0_24, %c0_25, %c0_26, %c0_27], %39 {strides = array<i32>} : memref<1x4x16x16xbf16, #tpu.memory_space<vmem>>, vector<1x1x16x16xbf16>,
    %40 = arith.truncf %35 : vector<16x16xf32> to vector<16x16xbf16>
    %cst_28 = arith.constant dense<0.000000e+00> : vector<16x16xf32>
    %41 = tpu.matmul %40, %17, %cst_28 {dimension_numbers = #tpu.dot_dimension_numbers<[1], [0], [0], [1], [0, 0, 1, 1], [], []>} : vector<16x16xbf16>, vector<16x16xbf16>, vector<16x16xf32> -> vector<16x16xf32>
    %42 = arith.truncf %41 : vector<16x16xf32> to vector<16x16xbf16>
    %c0_29 = arith.constant 0 : index
    %c0_30 = arith.constant 0 : index
    %c0_31 = arith.constant 0 : index
    %43 = vector.load %arg10[%c0_29, %c0_30, %c0_31] : memref<4x16x64xbf16, #tpu.memory_space<vmem>>, vector<1x16x64xbf16>
    %44 = vector.shape_cast %43 : vector<1x16x64xbf16> to vector<16x64xbf16>
    %cst_32 = arith.constant dense<0.000000e+00> : vector<16x64xf32>
    %45 = tpu.matmul %42, %44, %cst_32 {dimension_numbers = #tpu.dot_dimension_numbers<[1], [0], [0], [1], [0, 0, 1, 1], [], []>} : vector<16x16xbf16>, vector<16x64xbf16>, vector<16x64xf32> -> vector<16x64xf32>
    %46 = arith.addf %6, %45 : vector<16x64xf32>
    %c1 = arith.constant 1 : index
    %c0_33 = arith.constant 0 : index
    %c0_34 = arith.constant 0 : index
    %47 = vector.load %arg4[%c1, %c0_33, %c0_34] : memref<4x64x16xbf16, #tpu.memory_space<vmem>>, vector<1x64x16xbf16>
    %48 = vector.shape_cast %47 : vector<1x64x16xbf16> to vector<64x16xbf16>
    %cst_35 = arith.constant dense<0.000000e+00> : vector<16x16xf32>
    %49 = tpu.matmul %5, %48, %cst_35 {dimension_numbers = #tpu.dot_dimension_numbers<[1], [0], [0], [1], [0, 0, 1, 1], [], []>} : vector<16x64xbf16>, vector<64x16xbf16>, vector<16x16xf32> -> vector<16x16xf32>
    %c1_36 = arith.constant 1 : index
    %c0_37 = arith.constant 0 : index
    %c0_38 = arith.constant 0 : index
    %50 = vector.load %arg5[%c1_36, %c0_37, %c0_38] : memref<4x1x16xf32, #tpu.memory_space<vmem>>, vector<1x1x16xf32>
    %51 = vector.shape_cast %50 : vector<1x1x16xf32> to vector<1x16xf32>
    %52 = vector.broadcast %51 : vector<1x16xf32> to vector<16x16xf32>
    %53 = arith.addf %49, %52 : vector<16x16xf32>
    %c1_39 = arith.constant 1 : index
    %c0_40 = arith.constant 0 : index
    %c0_41 = arith.constant 0 : index
    %54 = vector.load %arg23[%c1_39, %c0_40, %c0_41] : memref<4x16x16xbf16, #tpu.memory_space<vmem>>, vector<1x16x16xbf16>
    %55 = vector.shape_cast %54 : vector<1x16x16xbf16> to vector<16x16xbf16>
    %c1_42 = arith.constant 1 : index
    %c0_43 = arith.constant 0 : index
    %c0_44 = arith.constant 0 : index
    %56 = vector.load %arg24[%c1_42, %c0_43, %c0_44] : memref<4x16x16xbf16, #tpu.memory_space<vmem>>, vector<1x16x16xbf16>
    %57 = vector.shape_cast %56 : vector<1x16x16xbf16> to vector<16x16xbf16>
    %58 = arith.truncf %53 : vector<16x16xf32> to vector<16x16xbf16>
    %cst_45 = arith.constant dense<0.000000e+00> : vector<16x16xf32>
    %59 = tpu.matmul %58, %55, %cst_45 {dimension_numbers = #tpu.dot_dimension_numbers<[1], [1], [0], [0], [0, 0, 1, 0], [], []>} : vector<16x16xbf16>, vector<16x16xbf16>, vector<16x16xf32> -> vector<16x16xf32>
    %cst_46 = arith.constant 2.500000e-01 : f32
    %60 = vector.broadcast %cst_46 : f32 to vector<16x16xf32>
    %61 = arith.mulf %59, %60 : vector<16x16xf32>
    %62 = arith.truncf %61 : vector<16x16xf32> to vector<16x16xbf16>
    %c0_47 = arith.constant 0 : index
    %c1_48 = arith.constant 1 : index
    %c0_49 = arith.constant 0 : index
    %c0_50 = arith.constant 0 : index
    %63 = vector.load %arg22[%c0_47, %c1_48, %c0_49, %c0_50] : memref<1x4x16x16xbf16, #tpu.memory_space<vmem>>, vector<1x1x16x16xbf16>
    %64 = vector.shape_cast %63 : vector<1x1x16x16xbf16> to vector<16x16xbf16>
    %65 = vector.shape_cast %62 : vector<16x16xbf16> to vector<1x1x16x16xbf16>
    tpu.vector_store %arg22[%c0_47, %c1_48, %c0_49, %c0_50], %65 {strides = array<i32>} : memref<1x4x16x16xbf16, #tpu.memory_space<vmem>>, vector<1x1x16x16xbf16>,
    %cst_51 = arith.constant dense<0xFF800000> : vector<16xf32>
    %66 = vector.multi_reduction <maximumf>, %61, %cst_51 [1] : vector<16x16xf32> to vector<16xf32>
    %67 = vector.shape_cast %66 : vector<16xf32> to vector<16x1xf32>
    %68 = vector.broadcast %67 : vector<16x1xf32> to vector<16x16xf32>
    %69 = arith.subf %61, %68 : vector<16x16xf32>
    %70 = math.exp %69 : vector<16x16xf32>
    %cst_52 = arith.constant dense<0.000000e+00> : vector<16xf32>
    %71 = vector.multi_reduction <add>, %70, %cst_52 [1] : vector<16x16xf32> to vector<16xf32>
    %72 = vector.shape_cast %71 : vector<16xf32> to vector<16x1xf32>
    %73 = tpu.reciprocal %72 {approx = true} : vector<16x1xf32> -> vector<16x1xf32>
    %74 = vector.broadcast %73 : vector<16x1xf32> to vector<16x16xf32>
    %75 = arith.mulf %70, %74 : vector<16x16xf32>
    %76 = arith.truncf %75 : vector<16x16xf32> to vector<16x16xbf16>
    %c0_53 = arith.constant 0 : index
    %c1_54 = arith.constant 1 : index
    %c0_55 = arith.constant 0 : index
    %c0_56 = arith.constant 0 : index
    %77 = vector.load %arg21[%c0_53, %c1_54, %c0_55, %c0_56] : memref<1x4x16x16xbf16, #tpu.memory_space<vmem>>, vector<1x1x16x16xbf16>
    %78 = vector.shape_cast %77 : vector<1x1x16x16xbf16> to vector<16x16xbf16>
    %79 = vector.shape_cast %76 : vector<16x16xbf16> to vector<1x1x16x16xbf16>
    tpu.vector_store %arg21[%c0_53, %c1_54, %c0_55, %c0_56], %79 {strides = array<i32>} : memref<1x4x16x16xbf16, #tpu.memory_space<vmem>>, vector<1x1x16x16xbf16>,
    %80 = arith.truncf %75 : vector<16x16xf32> to vector<16x16xbf16>
    %cst_57 = arith.constant dense<0.000000e+00> : vector<16x16xf32>
    %81 = tpu.matmul %80, %57, %cst_57 {dimension_numbers = #tpu.dot_dimension_numbers<[1], [0], [0], [1], [0, 0, 1, 1], [], []>} : vector<16x16xbf16>, vector<16x16xbf16>, vector<16x16xf32> -> vector<16x16xf32>
    %82 = arith.truncf %81 : vector<16x16xf32> to vector<16x16xbf16>
    %c1_58 = arith.constant 1 : index
    %c0_59 = arith.constant 0 : index
    %c0_60 = arith.constant 0 : index
    %83 = vector.load %arg10[%c1_58, %c0_59, %c0_60] : memref<4x16x64xbf16, #tpu.memory_space<vmem>>, vector<1x16x64xbf16>
    %84 = vector.shape_cast %83 : vector<1x16x64xbf16> to vector<16x64xbf16>
    %cst_61 = arith.constant dense<0.000000e+00> : vector<16x64xf32>
    %85 = tpu.matmul %82, %84, %cst_61 {dimension_numbers = #tpu.dot_dimension_numbers<[1], [0], [0], [1], [0, 0, 1, 1], [], []>} : vector<16x16xbf16>, vector<16x64xbf16>, vector<16x64xf32> -> vector<16x64xf32>
    %86 = arith.addf %46, %85 : vector<16x64xf32>
    %c2 = arith.constant 2 : index
    %c0_62 = arith.constant 0 : index
    %c0_63 = arith.constant 0 : index
    %87 = vector.load %arg4[%c2, %c0_62, %c0_63] : memref<4x64x16xbf16, #tpu.memory_space<vmem>>, vector<1x64x16xbf16>
    %88 = vector.shape_cast %87 : vector<1x64x16xbf16> to vector<64x16xbf16>
    %cst_64 = arith.constant dense<0.000000e+00> : vector<16x16xf32>
    %89 = tpu.matmul %5, %88, %cst_64 {dimension_numbers = #tpu.dot_dimension_numbers<[1], [0], [0], [1], [0, 0, 1, 1], [], []>} : vector<16x64xbf16>, vector<64x16xbf16>, vector<16x16xf32> -> vector<16x16xf32>
    %c2_65 = arith.constant 2 : index
    %c0_66 = arith.constant 0 : index
    %c0_67 = arith.constant 0 : index
    %90 = vector.load %arg5[%c2_65, %c0_66, %c0_67] : memref<4x1x16xf32, #tpu.memory_space<vmem>>, vector<1x1x16xf32>
    %91 = vector.shape_cast %90 : vector<1x1x16xf32> to vector<1x16xf32>
    %92 = vector.broadcast %91 : vector<1x16xf32> to vector<16x16xf32>
    %93 = arith.addf %89, %92 : vector<16x16xf32>
    %c2_68 = arith.constant 2 : index
    %c0_69 = arith.constant 0 : index
    %c0_70 = arith.constant 0 : index
    %94 = vector.load %arg23[%c2_68, %c0_69, %c0_70] : memref<4x16x16xbf16, #tpu.memory_space<vmem>>, vector<1x16x16xbf16>
    %95 = vector.shape_cast %94 : vector<1x16x16xbf16> to vector<16x16xbf16>
    %c2_71 = arith.constant 2 : index
    %c0_72 = arith.constant 0 : index
    %c0_73 = arith.constant 0 : index
    %96 = vector.load %arg24[%c2_71, %c0_72, %c0_73] : memref<4x16x16xbf16, #tpu.memory_space<vmem>>, vector<1x16x16xbf16>
    %97 = vector.shape_cast %96 : vector<1x16x16xbf16> to vector<16x16xbf16>
    %98 = arith.truncf %93 : vector<16x16xf32> to vector<16x16xbf16>
    %cst_74 = arith.constant dense<0.000000e+00> : vector<16x16xf32>
    %99 = tpu.matmul %98, %95, %cst_74 {dimension_numbers = #tpu.dot_dimension_numbers<[1], [1], [0], [0], [0, 0, 1, 0], [], []>} : vector<16x16xbf16>, vector<16x16xbf16>, vector<16x16xf32> -> vector<16x16xf32>
    %cst_75 = arith.constant 2.500000e-01 : f32
    %100 = vector.broadcast %cst_75 : f32 to vector<16x16xf32>
    %101 = arith.mulf %99, %100 : vector<16x16xf32>
    %102 = arith.truncf %101 : vector<16x16xf32> to vector<16x16xbf16>
    %c0_76 = arith.constant 0 : index
    %c2_77 = arith.constant 2 : index
    %c0_78 = arith.constant 0 : index
    %c0_79 = arith.constant 0 : index
    %103 = vector.load %arg22[%c0_76, %c2_77, %c0_78, %c0_79] : memref<1x4x16x16xbf16, #tpu.memory_space<vmem>>, vector<1x1x16x16xbf16>
    %104 = vector.shape_cast %103 : vector<1x1x16x16xbf16> to vector<16x16xbf16>
    %105 = vector.shape_cast %102 : vector<16x16xbf16> to vector<1x1x16x16xbf16>
    tpu.vector_store %arg22[%c0_76, %c2_77, %c0_78, %c0_79], %105 {strides = array<i32>} : memref<1x4x16x16xbf16, #tpu.memory_space<vmem>>, vector<1x1x16x16xbf16>,
    %cst_80 = arith.constant dense<0xFF800000> : vector<16xf32>
    %106 = vector.multi_reduction <maximumf>, %101, %cst_80 [1] : vector<16x16xf32> to vector<16xf32>
    %107 = vector.shape_cast %106 : vector<16xf32> to vector<16x1xf32>
    %108 = vector.broadcast %107 : vector<16x1xf32> to vector<16x16xf32>
    %109 = arith.subf %101, %108 : vector<16x16xf32>
    %110 = math.exp %109 : vector<16x16xf32>
    %cst_81 = arith.constant dense<0.000000e+00> : vector<16xf32>
    %111 = vector.multi_reduction <add>, %110, %cst_81 [1] : vector<16x16xf32> to vector<16xf32>
    %112 = vector.shape_cast %111 : vector<16xf32> to vector<16x1xf32>
    %113 = tpu.reciprocal %112 {approx = true} : vector<16x1xf32> -> vector<16x1xf32>
    %114 = vector.broadcast %113 : vector<16x1xf32> to vector<16x16xf32>
    %115 = arith.mulf %110, %114 : vector<16x16xf32>
    %116 = arith.truncf %115 : vector<16x16xf32> to vector<16x16xbf16>
    %c0_82 = arith.constant 0 : index
    %c2_83 = arith.constant 2 : index
    %c0_84 = arith.constant 0 : index
    %c0_85 = arith.constant 0 : index
    %117 = vector.load %arg21[%c0_82, %c2_83, %c0_84, %c0_85] : memref<1x4x16x16xbf16, #tpu.memory_space<vmem>>, vector<1x1x16x16xbf16>
    %118 = vector.shape_cast %117 : vector<1x1x16x16xbf16> to vector<16x16xbf16>
    %119 = vector.shape_cast %116 : vector<16x16xbf16> to vector<1x1x16x16xbf16>
    tpu.vector_store %arg21[%c0_82, %c2_83, %c0_84, %c0_85], %119 {strides = array<i32>} : memref<1x4x16x16xbf16, #tpu.memory_space<vmem>>, vector<1x1x16x16xbf16>,
    %120 = arith.truncf %115 : vector<16x16xf32> to vector<16x16xbf16>
    %cst_86 = arith.constant dense<0.000000e+00> : vector<16x16xf32>
    %121 = tpu.matmul %120, %97, %cst_86 {dimension_numbers = #tpu.dot_dimension_numbers<[1], [0], [0], [1], [0, 0, 1, 1], [], []>} : vector<16x16xbf16>, vector<16x16xbf16>, vector<16x16xf32> -> vector<16x16xf32>
    %122 = arith.truncf %121 : vector<16x16xf32> to vector<16x16xbf16>
    %c2_87 = arith.constant 2 : index
    %c0_88 = arith.constant 0 : index
    %c0_89 = arith.constant 0 : index
    %123 = vector.load %arg10[%c2_87, %c0_88, %c0_89] : memref<4x16x64xbf16, #tpu.memory_space<vmem>>, vector<1x16x64xbf16>
    %124 = vector.shape_cast %123 : vector<1x16x64xbf16> to vector<16x64xbf16>
    %cst_90 = arith.constant dense<0.000000e+00> : vector<16x64xf32>
    %125 = tpu.matmul %122, %124, %cst_90 {dimension_numbers = #tpu.dot_dimension_numbers<[1], [0], [0], [1], [0, 0, 1, 1], [], []>} : vector<16x16xbf16>, vector<16x64xbf16>, vector<16x64xf32> -> vector<16x64xf32>
    %126 = arith.addf %86, %125 : vector<16x64xf32>
    %c3 = arith.constant 3 : index
    %c0_91 = arith.constant 0 : index
    %c0_92 = arith.constant 0 : index
    %127 = vector.load %arg4[%c3, %c0_91, %c0_92] : memref<4x64x16xbf16, #tpu.memory_space<vmem>>, vector<1x64x16xbf16>
    %128 = vector.shape_cast %127 : vector<1x64x16xbf16> to vector<64x16xbf16>
    %cst_93 = arith.constant dense<0.000000e+00> : vector<16x16xf32>
    %129 = tpu.matmul %5, %128, %cst_93 {dimension_numbers = #tpu.dot_dimension_numbers<[1], [0], [0], [1], [0, 0, 1, 1], [], []>} : vector<16x64xbf16>, vector<64x16xbf16>, vector<16x16xf32> -> vector<16x16xf32>
    %c3_94 = arith.constant 3 : index
    %c0_95 = arith.constant 0 : index
    %c0_96 = arith.constant 0 : index
    %130 = vector.load %arg5[%c3_94, %c0_95, %c0_96] : memref<4x1x16xf32, #tpu.memory_space<vmem>>, vector<1x1x16xf32>
    %131 = vector.shape_cast %130 : vector<1x1x16xf32> to vector<1x16xf32>
    %132 = vector.broadcast %131 : vector<1x16xf32> to vector<16x16xf32>
    %133 = arith.addf %129, %132 : vector<16x16xf32>
    %c3_97 = arith.constant 3 : index
    %c0_98 = arith.constant 0 : index
    %c0_99 = arith.constant 0 : index
    %134 = vector.load %arg23[%c3_97, %c0_98, %c0_99] : memref<4x16x16xbf16, #tpu.memory_space<vmem>>, vector<1x16x16xbf16>
    %135 = vector.shape_cast %134 : vector<1x16x16xbf16> to vector<16x16xbf16>
    %c3_100 = arith.constant 3 : index
    %c0_101 = arith.constant 0 : index
    %c0_102 = arith.constant 0 : index
    %136 = vector.load %arg24[%c3_100, %c0_101, %c0_102] : memref<4x16x16xbf16, #tpu.memory_space<vmem>>, vector<1x16x16xbf16>
    %137 = vector.shape_cast %136 : vector<1x16x16xbf16> to vector<16x16xbf16>
    %138 = arith.truncf %133 : vector<16x16xf32> to vector<16x16xbf16>
    %cst_103 = arith.constant dense<0.000000e+00> : vector<16x16xf32>
    %139 = tpu.matmul %138, %135, %cst_103 {dimension_numbers = #tpu.dot_dimension_numbers<[1], [1], [0], [0], [0, 0, 1, 0], [], []>} : vector<16x16xbf16>, vector<16x16xbf16>, vector<16x16xf32> -> vector<16x16xf32>
    %cst_104 = arith.constant 2.500000e-01 : f32
    %140 = vector.broadcast %cst_104 : f32 to vector<16x16xf32>
    %141 = arith.mulf %139, %140 : vector<16x16xf32>
    %142 = arith.truncf %141 : vector<16x16xf32> to vector<16x16xbf16>
    %c0_105 = arith.constant 0 : index
    %c3_106 = arith.constant 3 : index
    %c0_107 = arith.constant 0 : index
    %c0_108 = arith.constant 0 : index
    %143 = vector.load %arg22[%c0_105, %c3_106, %c0_107, %c0_108] : memref<1x4x16x16xbf16, #tpu.memory_space<vmem>>, vector<1x1x16x16xbf16>
    %144 = vector.shape_cast %143 : vector<1x1x16x16xbf16> to vector<16x16xbf16>
    %145 = vector.shape_cast %142 : vector<16x16xbf16> to vector<1x1x16x16xbf16>
    tpu.vector_store %arg22[%c0_105, %c3_106, %c0_107, %c0_108], %145 {strides = array<i32>} : memref<1x4x16x16xbf16, #tpu.memory_space<vmem>>, vector<1x1x16x16xbf16>,
    %cst_109 = arith.constant dense<0xFF800000> : vector<16xf32>
    %146 = vector.multi_reduction <maximumf>, %141, %cst_109 [1] : vector<16x16xf32> to vector<16xf32>
    %147 = vector.shape_cast %146 : vector<16xf32> to vector<16x1xf32>
    %148 = vector.broadcast %147 : vector<16x1xf32> to vector<16x16xf32>
    %149 = arith.subf %141, %148 : vector<16x16xf32>
    %150 = math.exp %149 : vector<16x16xf32>
    %cst_110 = arith.constant dense<0.000000e+00> : vector<16xf32>
    %151 = vector.multi_reduction <add>, %150, %cst_110 [1] : vector<16x16xf32> to vector<16xf32>
    %152 = vector.shape_cast %151 : vector<16xf32> to vector<16x1xf32>
    %153 = tpu.reciprocal %152 {approx = true} : vector<16x1xf32> -> vector<16x1xf32>
    %154 = vector.broadcast %153 : vector<16x1xf32> to vector<16x16xf32>
    %155 = arith.mulf %150, %154 : vector<16x16xf32>
    %156 = arith.truncf %155 : vector<16x16xf32> to vector<16x16xbf16>
    %c0_111 = arith.constant 0 : index
    %c3_112 = arith.constant 3 : index
    %c0_113 = arith.constant 0 : index
    %c0_114 = arith.constant 0 : index
    %157 = vector.load %arg21[%c0_111, %c3_112, %c0_113, %c0_114] : memref<1x4x16x16xbf16, #tpu.memory_space<vmem>>, vector<1x1x16x16xbf16>
    %158 = vector.shape_cast %157 : vector<1x1x16x16xbf16> to vector<16x16xbf16>
    %159 = vector.shape_cast %156 : vector<16x16xbf16> to vector<1x1x16x16xbf16>
    tpu.vector_store %arg21[%c0_111, %c3_112, %c0_113, %c0_114], %159 {strides = array<i32>} : memref<1x4x16x16xbf16, #tpu.memory_space<vmem>>, vector<1x1x16x16xbf16>,
    %160 = arith.truncf %155 : vector<16x16xf32> to vector<16x16xbf16>
    %cst_115 = arith.constant dense<0.000000e+00> : vector<16x16xf32>
    %161 = tpu.matmul %160, %137, %cst_115 {dimension_numbers = #tpu.dot_dimension_numbers<[1], [0], [0], [1], [0, 0, 1, 1], [], []>} : vector<16x16xbf16>, vector<16x16xbf16>, vector<16x16xf32> -> vector<16x16xf32>
    %162 = arith.truncf %161 : vector<16x16xf32> to vector<16x16xbf16>
    %c3_116 = arith.constant 3 : index
    %c0_117 = arith.constant 0 : index
    %c0_118 = arith.constant 0 : index
    %163 = vector.load %arg10[%c3_116, %c0_117, %c0_118] : memref<4x16x64xbf16, #tpu.memory_space<vmem>>, vector<1x16x64xbf16>
    %164 = vector.shape_cast %163 : vector<1x16x64xbf16> to vector<16x64xbf16>
    %cst_119 = arith.constant dense<0.000000e+00> : vector<16x64xf32>
    %165 = tpu.matmul %162, %164, %cst_119 {dimension_numbers = #tpu.dot_dimension_numbers<[1], [0], [0], [1], [0, 0, 1, 1], [], []>} : vector<16x16xbf16>, vector<16x64xbf16>, vector<16x64xf32> -> vector<16x64xf32>
    %166 = arith.addf %126, %165 : vector<16x64xf32>
    %c0_120 = arith.constant 0 : index
    %c0_121 = arith.constant 0 : index
    %167 = vector.load %arg11[%c0_120, %c0_121] : memref<1x64xf32, #tpu.memory_space<vmem>>, vector<1x64xf32>
    %168 = vector.broadcast %167 : vector<1x64xf32> to vector<16x64xf32>
    %169 = arith.addf %166, %168 : vector<16x64xf32>
    %170 = arith.addf %1, %169 : vector<16x64xf32>
    %c0_122 = arith.constant 0 : index
    %c0_123 = arith.constant 0 : index
    %171 = vector.load %arg12[%c0_122, %c0_123] : memref<1x64xf32, #tpu.memory_space<vmem>>, vector<1x64xf32>
    %c0_124 = arith.constant 0 : index
    %c0_125 = arith.constant 0 : index
    %172 = vector.load %arg13[%c0_124, %c0_125] : memref<1x64xf32, #tpu.memory_space<vmem>>, vector<1x64xf32>
    %cst_126 = arith.constant dense<0.000000e+00> : vector<16xf32>
    %173 = vector.multi_reduction <add>, %170, %cst_126 [1] : vector<16x64xf32> to vector<16xf32>
    %174 = vector.shape_cast %173 : vector<16xf32> to vector<16x1xf32>
    %cst_127 = arith.constant 6.400000e+01 : f32
    %175 = vector.broadcast %cst_127 : f32 to vector<16x1xf32>
    %176 = arith.divf %174, %175 : vector<16x1xf32>
    %177 = vector.broadcast %176 : vector<16x1xf32> to vector<16x64xf32>
    %178 = arith.subf %170, %177 : vector<16x64xf32>
    %179 = arith.mulf %178, %178 : vector<16x64xf32>
    %cst_128 = arith.constant dense<0.000000e+00> : vector<16xf32>
    %180 = vector.multi_reduction <add>, %179, %cst_128 [1] : vector<16x64xf32> to vector<16xf32>
    %181 = vector.shape_cast %180 : vector<16xf32> to vector<16x1xf32>
    %cst_129 = arith.constant 6.400000e+01 : f32
    %182 = vector.broadcast %cst_129 : f32 to vector<16x1xf32>
    %183 = arith.divf %181, %182 : vector<16x1xf32>
    %184 = vector.broadcast %176 : vector<16x1xf32> to vector<16x64xf32>
    %185 = arith.subf %170, %184 : vector<16x64xf32>
    %cst_130 = arith.constant 9.99999974E-6 : f32
    %186 = vector.broadcast %cst_130 : f32 to vector<16x1xf32>
    %187 = arith.addf %183, %186 : vector<16x1xf32>
    %188 = math.rsqrt %187 : vector<16x1xf32>
    %189 = vector.broadcast %188 : vector<16x1xf32> to vector<16x64xf32>
    %190 = arith.mulf %185, %189 : vector<16x64xf32>
    %191 = vector.broadcast %171 : vector<1x64xf32> to vector<16x64xf32>
    %192 = arith.mulf %190, %191 : vector<16x64xf32>
    %193 = vector.broadcast %172 : vector<1x64xf32> to vector<16x64xf32>
    %194 = arith.addf %192, %193 : vector<16x64xf32>
    %195 = arith.truncf %194 : vector<16x64xf32> to vector<16x64xbf16>
    %c0_131 = arith.constant 0 : index
    %c0_132 = arith.constant 0 : index
    %196 = vector.load %arg14[%c0_131, %c0_132] : memref<64x256xbf16, #tpu.memory_space<vmem>>, vector<64x256xbf16>
    %cst_133 = arith.constant dense<0.000000e+00> : vector<16x256xf32>
    %197 = tpu.matmul %195, %196, %cst_133 {dimension_numbers = #tpu.dot_dimension_numbers<[1], [0], [0], [1], [0, 0, 1, 1], [], []>} : vector<16x64xbf16>, vector<64x256xbf16>, vector<16x256xf32> -> vector<16x256xf32>
    %c0_134 = arith.constant 0 : index
    %c0_135 = arith.constant 0 : index
    %198 = vector.load %arg15[%c0_134, %c0_135] : memref<1x256xf32, #tpu.memory_space<vmem>>, vector<1x256xf32>
    %199 = vector.broadcast %198 : vector<1x256xf32> to vector<16x256xf32>
    %200 = arith.addf %197, %199 : vector<16x256xf32>
    %cst_136 = arith.constant 0.000000e+00 : f32
    %201 = vector.broadcast %cst_136 : f32 to vector<16x256xf32>
    %202 = arith.maximumf %200, %201 : vector<16x256xf32>
    %203 = arith.truncf %202 : vector<16x256xf32> to vector<16x256xbf16>
    %c0_137 = arith.constant 0 : index
    %c0_138 = arith.constant 0 : index
    %204 = vector.load %arg16[%c0_137, %c0_138] : memref<256x64xbf16, #tpu.memory_space<vmem>>, vector<256x64xbf16>
    %cst_139 = arith.constant dense<0.000000e+00> : vector<16x64xf32>
    %205 = tpu.matmul %203, %204, %cst_139 {dimension_numbers = #tpu.dot_dimension_numbers<[1], [0], [0], [1], [0, 0, 1, 1], [], []>} : vector<16x256xbf16>, vector<256x64xbf16>, vector<16x64xf32> -> vector<16x64xf32>
    %c0_140 = arith.constant 0 : index
    %c0_141 = arith.constant 0 : index
    %206 = vector.load %arg17[%c0_140, %c0_141] : memref<1x64xf32, #tpu.memory_space<vmem>>, vector<1x64xf32>
    %207 = vector.broadcast %206 : vector<1x64xf32> to vector<16x64xf32>
    %208 = arith.addf %205, %207 : vector<16x64xf32>
    %209 = arith.addf %194, %208 : vector<16x64xf32>
    %c0_142 = arith.constant 0 : index
    %c0_143 = arith.constant 0 : index
    %210 = vector.load %arg18[%c0_142, %c0_143] : memref<1x64xf32, #tpu.memory_space<vmem>>, vector<1x64xf32>
    %c0_144 = arith.constant 0 : index
    %c0_145 = arith.constant 0 : index
    %211 = vector.load %arg19[%c0_144, %c0_145] : memref<1x64xf32, #tpu.memory_space<vmem>>, vector<1x64xf32>
    %cst_146 = arith.constant dense<0.000000e+00> : vector<16xf32>
    %212 = vector.multi_reduction <add>, %209, %cst_146 [1] : vector<16x64xf32> to vector<16xf32>
    %213 = vector.shape_cast %212 : vector<16xf32> to vector<16x1xf32>
    %cst_147 = arith.constant 6.400000e+01 : f32
    %214 = vector.broadcast %cst_147 : f32 to vector<16x1xf32>
    %215 = arith.divf %213, %214 : vector<16x1xf32>
    %216 = vector.broadcast %215 : vector<16x1xf32> to vector<16x64xf32>
    %217 = arith.subf %209, %216 : vector<16x64xf32>
    %218 = arith.mulf %217, %217 : vector<16x64xf32>
    %cst_148 = arith.constant dense<0.000000e+00> : vector<16xf32>
    %219 = vector.multi_reduction <add>, %218, %cst_148 [1] : vector<16x64xf32> to vector<16xf32>
    %220 = vector.shape_cast %219 : vector<16xf32> to vector<16x1xf32>
    %cst_149 = arith.constant 6.400000e+01 : f32
    %221 = vector.broadcast %cst_149 : f32 to vector<16x1xf32>
    %222 = arith.divf %220, %221 : vector<16x1xf32>
    %223 = vector.broadcast %215 : vector<16x1xf32> to vector<16x64xf32>
    %224 = arith.subf %209, %223 : vector<16x64xf32>
    %cst_150 = arith.constant 9.99999974E-6 : f32
    %225 = vector.broadcast %cst_150 : f32 to vector<16x1xf32>
    %226 = arith.addf %222, %225 : vector<16x1xf32>
    %227 = math.rsqrt %226 : vector<16x1xf32>
    %228 = vector.broadcast %227 : vector<16x1xf32> to vector<16x64xf32>
    %229 = arith.mulf %224, %228 : vector<16x64xf32>
    %230 = vector.broadcast %210 : vector<1x64xf32> to vector<16x64xf32>
    %231 = arith.mulf %229, %230 : vector<16x64xf32>
    %232 = vector.broadcast %211 : vector<1x64xf32> to vector<16x64xf32>
    %233 = arith.addf %231, %232 : vector<16x64xf32>
    %c0_151 = arith.constant 0 : index
    %c0_152 = arith.constant 0 : index
    %c0_153 = arith.constant 0 : index
    %234 = vector.load %arg20[%c0_151, %c0_152, %c0_153] : memref<1x16x64xf32, #tpu.memory_space<vmem>>, vector<1x16x64xf32>
    %235 = vector.shape_cast %234 : vector<1x16x64xf32> to vector<16x64xf32>
    %236 = vector.shape_cast %233 : vector<16x64xf32> to vector<1x16x64xf32>
    tpu.vector_store %arg20[%c0_151, %c0_152, %c0_153], %236 {strides = array<i32>} : memref<1x16x64xf32, #tpu.memory_space<vmem>>, vector<1x16x64xf32>,
    return
  }
  func.func @transform_0(%arg0: i32, %arg1: i32) -> (i32, i32, i32) {
    %c0_i32 = arith.constant 0 : i32
    %c0_i32_0 = arith.constant 0 : i32
    return %arg0, %arg1, %c0_i32 : i32, i32, i32
  }
  func.func @transform_1(%arg0: i32, %arg1: i32) -> (i32, i32, i32) {
    %c0_i32 = arith.constant 0 : i32
    %c0_i32_0 = arith.constant 0 : i32
    %c0_i32_1 = arith.constant 0 : i32
    return %arg0, %c0_i32, %c0_i32_0 : i32, i32, i32
  }
  func.func @transform_2(%arg0: i32, %arg1: i32) -> (i32, i32, i32) {
    %c0_i32 = arith.constant 0 : i32
    %c0_i32_0 = arith.constant 0 : i32
    %c0_i32_1 = arith.constant 0 : i32
    %c0_i32_2 = arith.constant 0 : i32
    return %c0_i32, %c0_i32_0, %c0_i32_1 : i32, i32, i32
  }
  func.func @transform_3(%arg0: i32, %arg1: i32) -> (i32, i32, i32) {
    %c0_i32 = arith.constant 0 : i32
    %c0_i32_0 = arith.constant 0 : i32
    %c0_i32_1 = arith.constant 0 : i32
    %c0_i32_2 = arith.constant 0 : i32
    return %c0_i32, %c0_i32_0, %c0_i32_1 : i32, i32, i32
  }
  func.func @transform_4(%arg0: i32, %arg1: i32) -> (i32, i32, i32) {
    %c0_i32 = arith.constant 0 : i32
    %c0_i32_0 = arith.constant 0 : i32
    %c0_i32_1 = arith.constant 0 : i32
    %c0_i32_2 = arith.constant 0 : i32
    return %c0_i32, %c0_i32_0, %c0_i32_1 : i32, i32, i32
  }
  func.func @transform_5(%arg0: i32, %arg1: i32) -> (i32, i32, i32) {
    %c0_i32 = arith.constant 0 : i32
    %c0_i32_0 = arith.constant 0 : i32
    %c0_i32_1 = arith.constant 0 : i32
    %c0_i32_2 = arith.constant 0 : i32
    return %c0_i32, %c0_i32_0, %c0_i32_1 : i32, i32, i32
  }
  func.func @transform_6(%arg0: i32, %arg1: i32) -> (i32, i32, i32) {
    %c0_i32 = arith.constant 0 : i32
    %c0_i32_0 = arith.constant 0 : i32
    %c0_i32_1 = arith.constant 0 : i32
    %c0_i32_2 = arith.constant 0 : i32
    return %c0_i32, %c0_i32_0, %c0_i32_1 : i32, i32, i32
  }
  func.func @transform_7(%arg0: i32, %arg1: i32) -> (i32, i32, i32) {
    %c0_i32 = arith.constant 0 : i32
    %c0_i32_0 = arith.constant 0 : i32
    %c0_i32_1 = arith.constant 0 : i32
    %c0_i32_2 = arith.constant 0 : i32
    return %c0_i32, %c0_i32_0, %c0_i32_1 : i32, i32, i32
  }
  func.func @transform_8(%arg0: i32, %arg1: i32) -> (i32, i32, i32) {
    %c0_i32 = arith.constant 0 : i32
    %c0_i32_0 = arith.constant 0 : i32
    %c0_i32_1 = arith.constant 0 : i32
    %c0_i32_2 = arith.constant 0 : i32
    return %c0_i32, %c0_i32_0, %c0_i32_1 : i32, i32, i32
  }
  func.func @transform_9(%arg0: i32, %arg1: i32) -> (i32, i32) {
    %c0_i32 = arith.constant 0 : i32
    %c0_i32_0 = arith.constant 0 : i32
    %c0_i32_1 = arith.constant 0 : i32
    return %c0_i32, %c0_i32_0 : i32, i32
  }
  func.func @transform_10(%arg0: i32, %arg1: i32) -> (i32, i32) {
    %c0_i32 = arith.constant 0 : i32
    %c0_i32_0 = arith.constant 0 : i32
    %c0_i32_1 = arith.constant 0 : i32
    return %c0_i32, %c0_i32_0 : i32, i32
  }
  func.func @transform_11(%arg0: i32, %arg1: i32) -> (i32, i32) {
    %c0_i32 = arith.constant 0 : i32
    %c0_i32_0 = arith.constant 0 : i32
    %c0_i32_1 = arith.constant 0 : i32
    return %c0_i32, %c0_i32_0 : i32, i32
  }
  func.func @transform_12(%arg0: i32, %arg1: i32) -> (i32, i32) {
    %c0_i32 = arith.constant 0 : i32
    %c0_i32_0 = arith.constant 0 : i32
    %c0_i32_1 = arith.constant 0 : i32
    return %c0_i32, %c0_i32_0 : i32, i32
  }
  func.func @transform_13(%arg0: i32, %arg1: i32) -> (i32, i32) {
    %c0_i32 = arith.constant 0 : i32
    %c0_i32_0 = arith.constant 0 : i32
    %c0_i32_1 = arith.constant 0 : i32
    return %c0_i32, %c0_i32_0 : i32, i32
  }
  func.func @transform_14(%arg0: i32, %arg1: i32) -> (i32, i32) {
    %c0_i32 = arith.constant 0 : i32
    %c0_i32_0 = arith.constant 0 : i32
    %c0_i32_1 = arith.constant 0 : i32
    return %c0_i32, %c0_i32_0 : i32, i32
  }
  func.func @transform_15(%arg0: i32, %arg1: i32) -> (i32, i32) {
    %c0_i32 = arith.constant 0 : i32
    %c0_i32_0 = arith.constant 0 : i32
    %c0_i32_1 = arith.constant 0 : i32
    return %c0_i32, %c0_i32_0 : i32, i32
  }
  func.func @transform_16(%arg0: i32, %arg1: i32) -> (i32, i32) {
    %c0_i32 = arith.constant 0 : i32
    %c0_i32_0 = arith.constant 0 : i32
    %c0_i32_1 = arith.constant 0 : i32
    return %c0_i32, %c0_i32_0 : i32, i32
  }
  func.func @transform_17(%arg0: i32, %arg1: i32) -> (i32, i32) {
    %c0_i32 = arith.constant 0 : i32
    %c0_i32_0 = arith.constant 0 : i32
    %c0_i32_1 = arith.constant 0 : i32
    return %c0_i32, %c0_i32_0 : i32, i32
  }
  func.func @transform_18(%arg0: i32, %arg1: i32) -> (i32, i32, i32) {
    %c0_i32 = arith.constant 0 : i32
    %c0_i32_0 = arith.constant 0 : i32
    return %arg0, %arg1, %c0_i32 : i32, i32, i32
  }
  func.func @transform_19(%arg0: i32, %arg1: i32) -> (i32, i32, i32, i32) {
    %c0_i32 = arith.constant 0 : i32
    %c0_i32_0 = arith.constant 0 : i32
    %c0_i32_1 = arith.constant 0 : i32
    return %arg0, %c0_i32, %arg1, %c0_i32_0 : i32, i32, i32, i32
  }
  func.func @transform_20(%arg0: i32, %arg1: i32) -> (i32, i32, i32, i32) {
    %c0_i32 = arith.constant 0 : i32
    %c0_i32_0 = arith.constant 0 : i32
    %c0_i32_1 = arith.constant 0 : i32
    return %arg0, %c0_i32, %arg1, %c0_i32_0 : i32, i32, i32, i32
  }
}

</mosaic_0001>

<bundles_post_ra>
// kernel: tpu_custom_call.1
= control target key start
LH: loop header
LB: loop body
LE: loop exit
PB: predicated region body
PF: predicated region fallthrough
CT: control target
= control target key end

     0   :  { %s4920_s0 = inlined_call_operand.vmem [shape: f32[2,16,64], index: 0, kind: input, shape index: {}]   ;;  %s4921_s1 = inlined_call_operand.vmem [shape: bf16[2,16,64], index: 1, kind: input, shape index: {}]   ;;  %s4922_s2 = inlined_call_operand.vmem [shape: bf16[4,64,16], index: 2, kind: input, shape index: {}]   ;;  %s4923_s3 = inlined_call_operand.vmem [shape: f32[4,1,16], index: 3, kind: input, shape index: {}]   ;;  %s4924_s4 = inlined_call_operand.vmem [shape: bf16[4,64,16], index: 4, kind: input, shape index: {}]   ;;  %s4925_s5 = inlined_call_operand.vmem [shape: f32[4,1,16], index: 5, kind: input, shape index: {}]   ;;  %s4926_s6 = inlined_call_operand.vmem [shape: bf16[4,64,16], index: 6, kind: input, shape index: {}]   ;;  %s4927_s7 = inlined_call_operand.vmem [shape: f32[4,1,16], index: 7, kind: input, shape index: {}]   ;;  %s4928_s8 = inlined_call_operand.vmem [shape: bf16[4,16,64], index: 8, kind: input, shape index: {}]   ;;  %s4929_s9 = inlined_call_operand.vmem [shape: f32[1,64], index: 9, kind: input, shape index: {}]   ;;  %s4930_s10 = inlined_call_operand.vmem [shape: f32[1,64], index: 10, kind: input, shape index: {}]   ;;  %s4931_s11 = inlined_call_operand.vmem [shape: f32[1,64], index: 11, kind: input, shape index: {}]   ;;  %s4932_s12 = inlined_call_operand.vmem [shape: bf16[64,256], index: 12, kind: input, shape index: {}]   ;;  %s4933_s13 = inlined_call_operand.vmem [shape: f32[1,256], index: 13, kind: input, shape index: {}]   ;;  %s4934_s14 = inlined_call_operand.vmem [shape: bf16[256,64], index: 14, kind: input, shape index: {}]   ;;  %s4935_s15 = inlined_call_operand.vmem [shape: f32[1,64], index: 15, kind: input, shape index: {}]   ;;  %s4936_s16 = inlined_call_operand.vmem [shape: f32[1,64], index: 16, kind: input, shape index: {}]   ;;  %s4937_s17 = inlined_call_operand.vmem [shape: f32[1,64], index: 17, kind: input, shape index: {}]   ;;  %s4938_s18 = inlined_call_operand.hbm [shape: f32[2,16,64], index: 18, kind: output, shape index: {0}]   ;;  %s4939_s19 = inlined_call_operand.hbm [shape: bf16[2,4,16,16], index: 19, kind: output, shape index: {1}]   ;;  %s4940_s20 = inlined_call_operand.hbm [shape: bf16[2,4,16,16], index: 20, kind: output, shape index: {2}]  }
   0x1   :  { %4954 = sst [smem:[#allocation16_spill]] %s4920_s0 }
   0x2   :  { %4955 = sst [smem:[#allocation17_spill]] %s4921_s1 }
   0x3   :  { %4956 = sst [smem:[#allocation18_spill]] %s4922_s2 }
   0x4   :  { %4957 = sst [smem:[#allocation19_spill]] %s4923_s3 }
   0x5   :  { %4958 = sst [smem:[#allocation20_spill]] %s4924_s4 }
   0x6   :  { %4959 = sst [smem:[#allocation21_spill]] %s4925_s5 }
   0x7   :  { %4960 = sst [smem:[#allocation22_spill]] %s4926_s6 }
   0x8   :  { %4961 = sst [smem:[#allocation23_spill]] %s4927_s7 }
   0x9   :  { %4962 = sst [smem:[#allocation24_spill]] %s4928_s8 }
   0xa   :  { %4963 = sst [smem:[#allocation25_spill]] %s4929_s9 }
   0xb   :  { %4964 = sst [smem:[#allocation26_spill]] %s4930_s10 }
   0xc   :  { %4965 = sst [smem:[#allocation27_spill]] %s4931_s11 }
   0xd   :  { %4966 = sst [smem:[#allocation28_spill]] %s4938_s18 }
   0xe   :  { %26 = vsyncpa [#allocation5], 0 }
   0xf   :  { %28 = vsyncpa [#allocation5 + $0x1], 0 }
  0x10   :  { %29 = vsyncpa [#allocation7], 0 }
  0x11   :  { %31 = vsyncpa [#allocation7 + $0x1], 0  ;;  %s4174_s1 = smov 0   ;;  %s4176_s22 = smov 0  }
  0x12   :  { %s4178_s23 = smov 0   ;;  %s4180_s24 = smov 0  }
  0x13   :  { %s4182_s2 = smov 0   ;;  %s4184_s25 = smov 0  }
  0x14 LB: > { %4967 = sst [smem:[#allocation11_spill]] %s4037_s1  ;;  %s4944_s3 = sadd.s32 4294967295, %s4057_s25   ;;  %s4057_s25 = sphi %s4184_s25, %s37_s25   ;;  %s4053_s2 = sphi %s4182_s2, %s4997_s2   ;;  %s4049_s24 = sphi %s4180_s24, %s4996_s24   ;;  %s4045_s23 = sphi %s4178_s23, %s4995_s23   ;;  %s4041_s22 = sphi %s4176_s22, %s4999_s22   ;;  %s4037_s1 = sphi %s4174_s1, %s4998_s1  }
  0x15   : > { %4968 = sst [smem:[#allocation12_spill]] %s4045_s23  ;;  %s4947_s26 = sadd.s32 4294967294, %s4057_s25  }
  0x16   : > { %4969 = sst [smem:[#allocation13_spill]] %s4053_s2  ;;  %s49_s27 = sadd.s32 1, %s4053_s2 }
  0x17   : > { %s448_s28 = sadd.s32 1, %s4045_s23  ;;  %p51_p0 = scmp.ge.s32.totalorder %s49_s27, 2 }
  0x18   : > { %p458_p1 = scmp.ne.s32.totalorder %s4045_s23, %s4041_s22  ;;  %p459_p2 = scmp.eq.s32.totalorder %s4944_s3, 1 }
  0x19   : > { %p464_p3 = scmp.ne.s32.totalorder %s4041_s22, %s4037_s1  ;;  %s5001_s27 = smov (%p51_p0, %s49_s27), 0 }
  0x1a   : > { %4970 = sst [smem:[#allocation14_spill]] %s5001_s27  ;;  %p4216_p4 = por %p459_p2, %p458_p1 }
  0x1b   : > { %p465_p5 = scmp.eq.s32.totalorder %s4947_s26, 1  ;;  %s443_s29 = ssub.s32 %s4053_s2, %s5001_s27 }
  0x1c   : > { %p3129_p6 = scmp.ge.s32.totalorder %s4057_s25, 1  ;;  %p446_p7 = scmp.eq.s32.totalorder %s443_s29, 0 }
  0x1d   : > { %p4225_p8 = por %p465_p5, %p464_p3  ;;  %p608_p9 = scmp.lt.s32.totalorder %s4057_s25, 3 }
  0x1e   : > { %s4231_s0 = scalar_select %p446_p7, %s4045_s23, %s448_s28  }
  0x1f   : > { %p609_p10 = pnand %p3129_p6, %p608_p9 }
  0x20   : > { %4973 = sst [smem:[#allocation15_spill]] %s4231_s0  ;;  %s4974_s1 = sld [smem:[#allocation20_spill]] (!%p609_p10)  ;;  %v4059_v1 = vmov (!%p609_p10), 0.0   ;;  %vm4060_vm0 = vmmov (!%p609_p10), 0   ;;  %vm756_vm1 = vcmask (!%p609_p10), 523264   ;;  %vm882_vm2 = vcmask (!%p609_p10), 130048  }
  0x21   : > { %612 = sbr.rel (%p609_p10) target bundleno = 4680 (0x1248), region = 92  ;;  %3510 = vmatprep.subr.bf16.mxu0 (!%p609_p10), %v4059_v1  ;;  %3522 = vmatprep.subr.bf16.mxu1 (!%p609_p10), %v4059_v1  ;;  %p686_p11 = scmp.lt.s32.totalorder (!%p609_p10), %s4049_s24, 1  ;;  %vm1542_vm3 = vcmask (!%p609_p10), 125952  }
  0x22   : > { %3518 = vmatprep.mubr.msk.bf16.mxu0 (!%p609_p10), %vm4060_vm0, %v4059_v1  ;;  %3530 = vmatprep.mubr.msk.bf16.mxu1 (!%p609_p10), %vm4060_vm0, %v4059_v1  ;;  %s4976_s27 = sld [smem:[#allocation17_spill]] (!%p609_p10)  ;;  %s4977_s29 = sld [smem:[#allocation18_spill]] (!%p609_p10) }
  0x23   : > { %s4978_s21 = sld [smem:[#allocation16_spill]] (!%p609_p10)  ;;  %s4979_s5 = sld [smem:[#allocation21_spill]] (!%p609_p10) }
  0x24   : > { %s4982_s6 = sld [smem:[#allocation22_spill]] (!%p609_p10)  ;;  %s4426_s28 = sand.u32 (!%p609_p10), 1, %s4041_s22  }
  0x25   : > { %s4983_s7 = sld [smem:[#allocation23_spill]] (!%p609_p10)  ;;  %s4985_s8 = sld [smem:[#allocation24_spill]] (!%p609_p10) }
  0x26   : > { %s4975_s18 = smov (!%p609_p10), %s4974_s1  ;;  %v3798_v0 = vld [vmem:[%s4974_s1] sm:$0xff] (!%p609_p10)   ;;  %s4986_s9 = sld [smem:[#allocation25_spill]] (!%p609_p10) }
  0x27   : > { %3511 = vmatpush3.bf16.msra.mxu0 (!%p609_p10), %v3798_v0  ;;  %v3799_v2 = vld [vmem:[%s4975_s18 + $0x8] sm:$0xff] (!%p609_p10)   ;;  %v3800_v3 = vld [vmem:[%s4975_s18 + $0x10] sm:$0xff] (!%p609_p10)   ;;  %v3801_v4 = vld [vmem:[%s4975_s18 + $0x18] sm:$0xff] (!%p609_p10)   ;;  %s4987_s10 = sld [smem:[#allocation26_spill]] (!%p609_p10)  ;;  %s4988_s11 = sld [smem:[#allocation27_spill]] (!%p609_p10) }
  0x28   : > { %3512 = vmatprep.subr.bf16.mxu0 %v4059_v1  ;;  %s4248_s1 = scalar_select %p686_p11, %s4049_s24, 1  ;;  %v3803_v6 = vld [vmem:[%s4975_s18 + $0x20] sm:$0xff]   ;;  %v3804_v7 = vld [vmem:[%s4975_s18 + $0x28] sm:$0xff]   ;;  %v3805_v8 = vld [vmem:[%s4975_s18 + $0x30] sm:$0xff]  }
  0x29   : > { %v3806_v9 = vld [vmem:[%s4975_s18 + $0x38] sm:$0xff]   ;;  %v3807_v10 = vld [vmem:[%s4975_s18 + $0x40] sm:$0xff]   ;;  %v3808_v11 = vld [vmem:[%s4975_s18 + $0x48] sm:$0xff]  }
  0x2a   : > { %s3384_s26 = sshll.u32 %s4248_s1, 3  ;;  %v3809_v12 = vld [vmem:[%s4975_s18 + $0x50] sm:$0xff]   ;;  %v3810_v13 = vld [vmem:[%s4975_s18 + $0x58] sm:$0xff]   ;;  %v3811_v14 = vld [vmem:[%s4975_s18 + $0x60] sm:$0xff]  }
  0x2b   : > { %3513 = vmatpush3.bf16.msra.mxu0 %v3799_v2  ;;  %s699_s2 = scalar_lea.vmem %s4976_s27, %s3384_s26  ;;  %v3812_v15 = vld [vmem:[%s4975_s18 + $0x68] sm:$0xff]   ;;  %v3813_v16 = vld [vmem:[%s4975_s18 + $0x70] sm:$0xff]   ;;  %v3814_v17 = vld [vmem:[%s4975_s18 + $0x78] sm:$0xff]   ;;  %s3383_s27 = sshll.u32 %s4248_s1, 4 }
  0x2c   : > { %3514 = vmatprep.subr.bf16.mxu0 %v4059_v1  ;;  %v4262_v5 = vld [vmem:[%s699_s2] sm:$0xff]   ;;  %v3816_v19 = vld [vmem:[%s4977_s29 + $0x8] sm:$0xff]   ;;  %v3817_v20 = vld [vmem:[%s4977_s29 + $0x10] sm:$0xff]   ;;  %s693_s18 = scalar_lea.vmem %s4978_s21, %s3383_s27  ;;  %s4980_s1 = sld [smem:[#allocation19_spill]] }
  0x2d   : > { %v3815_v18 = vld [vmem:[%s4977_s29] sm:$0xff]   ;;  %v3818_v21 = vld [vmem:[%s4977_s29 + $0x18] sm:$0xff]   ;;  %v4349_v23 = vld [vmem:[%s693_s18 + $0x8] sm:$0xff]  ;;  %s4984_s26 = sshll.u32 %s4426_s28, 5 }
  0x2e   : > { %v4347_v22 = vld [vmem:[%s693_s18] sm:$0xff]  ;;  %s4519_s23 = scalar_lea.vmem [#allocation6], %s4984_s26 }
  0x2f   : > { %3515 = vmatpush3.bf16.msra.mxu0 %v3800_v3  ;;  %v4354_v24 = vpack.c.bf16 %v4349_v23, %v4347_v22  ;;  %v3137_v25 = vld [vmem:[%s4979_s5] ss:$0 sm:$0xff]  ;;  %v3159_v33 = vld [vmem:[%s4979_s5 + $0x1] ss:$0 sm:$0xff]  ;;  %v3189_v43 = vld [vmem:[%s4979_s5 + $0x2] ss:$0 sm:$0xff] }
  0x30   : > { %3516 = vmatprep.subr.bf16.mxu0 %v4059_v1  ;;  %v3219_v51 = vld [vmem:[%s4979_s5 + $0x3] ss:$0 sm:$0xff]  ;;  %s2949_s26 = sshll.u32 %s4519_s23, 4  ;;  %s4062_s5 = smov [#allocation6]   ;;  %s4788_s26 = int_to_ptr.vmem [resolvable:$true] %s2949_s26 }
  0x31   : > { %s3919_s0 = scalar_lea.vmem %s4788_s26, 512 }
  0x32   : > { %s4981_s27 = smov %s4980_s1  ;;  %v3240_v59 = vld [vmem:[%s4980_s1] ss:$0 sm:$0xff]  ;;  %s4952_s1 = sshll.u32 %s4426_s28, 5 }
  0x33   : > { %3517 = vmatpush3.bf16.msra.mxu0 %v3801_v4  ;;  %v3819_v4 = vld [vmem:[%s4982_s6] sm:$0xff]   ;;  %s4432_s18 = scalar_lea.vmem [#allocation8], %s4952_s1  ;;  %p3920_p12 = scmp.ne.s32.totalorder %s4788_s26, %s3919_s0 }
  0x34   : > { %3534 = vmatprep.subr.bf16.mxu0 %v4059_v1  ;;  %3523 = vmatpush3.bf16.msra.mxu1 %v3819_v4 }
  0x35   : > { %3524 = vmatprep.subr.bf16.mxu1 %v4059_v1  ;;  %p3921_p13 = pnand %p3920_p12, %p4216_p4 }
  0x36   : > { %3519 = vmatmul.mubr.msk.bf16.vlgmr.msra.gmra.mrb[0].mxu0 %vm756_vm1, %v4262_v5 }
  0x37   : > { %3535 = vmatpush3.bf16.msra.mxu0 %v3803_v6  ;;  %3542 = vmatprep.mubr.msk.bf16.mxu0 %vm4060_vm0, %v4059_v1  ;;  %v3823_v6 = vld [vmem:[%s4977_s29 + $0x20] sm:$0xff]   ;;  %p3922_p0 = pneg %p3921_p13 }
  0x38   : > { %3536 = vmatprep.subr.bf16.mxu0 %v4059_v1 }
  0x3b   : > { %3537 = vmatpush3.bf16.msra.mxu0 %v3804_v7  ;;  %v3820_v7 = vld [vmem:[%s4982_s6 + $0x8] sm:$0xff]  }
  0x3c   : > { %3538 = vmatprep.subr.bf16.mxu0 %v4059_v1  ;;  %3525 = vmatpush3.bf16.msra.mxu1 %v3820_v7 }
  0x3d   : > { %3526 = vmatprep.subr.bf16.mxu1 %v4059_v1 }
  0x3f   : > { %3539 = vmatpush3.bf16.msra.mxu0 %v3805_v8  ;;  %v3824_v8 = vld [vmem:[%s4977_s29 + $0x28] sm:$0xff]  }
  0x40   : > { %3540 = vmatprep.subr.bf16.mxu0 %v4059_v1 }
  0x43   : > { %3541 = vmatpush3.bf16.msra.mxu0 %v3806_v9  ;;  %v3821_v9 = vld [vmem:[%s4982_s6 + $0x10] sm:$0xff]  }
  0x44   : > { %3558 = vmatprep.subr.bf16.mxu0 %v4059_v1  ;;  %3527 = vmatpush3.bf16.msra.mxu1 %v3821_v9 }
  0x45   : > { %3528 = vmatprep.subr.bf16.mxu1 %v4059_v1 }
  0x46   : > { %3543 = vmatmul.mubr.msk.bf16.vlgmr.msra.gmra.mrb[4].mxu0 %vm756_vm1, %v4262_v5 }
  0x47   : > { %3559 = vmatpush3.bf16.msra.mxu0 %v3807_v10  ;;  %3566 = vmatprep.mubr.msk.bf16.mxu0 %vm4060_vm0, %v4059_v1  ;;  %v3825_v10 = vld [vmem:[%s4977_s29 + $0x30] sm:$0xff]  }
  0x48   : > { %3560 = vmatprep.subr.bf16.mxu0 %v4059_v1 }
  0x4b   : > { %3561 = vmatpush3.bf16.msra.mxu0 %v3808_v11  ;;  %v3822_v11 = vld [vmem:[%s4982_s6 + $0x18] sm:$0xff]  }
  0x4c   : > { %3562 = vmatprep.subr.bf16.mxu0 %v4059_v1  ;;  %3529 = vmatpush3.bf16.msra.mxu1 %v3822_v11 }
  0x4d   : > { %3546 = vmatprep.subr.bf16.mxu1 %v4059_v1 }
  0x4f   : > { %3563 = vmatpush3.bf16.msra.mxu0 %v3809_v12  ;;  %v3826_v12 = vld [vmem:[%s4977_s29 + $0x38] sm:$0xff]   ;;  %3531 = vmatmul.mubr.msk.bf16.vlgmr.msra.gmra.mrb[0].mxu1 %vm756_vm1, %v4262_v5 }
  0x50   : > { %3564 = vmatprep.subr.bf16.mxu0 %v4059_v1  ;;  %3554 = vmatprep.mubr.msk.bf16.mxu1 %vm4060_vm0, %v4059_v1 }
  0x53   : > { %3565 = vmatpush3.bf16.msra.mxu0 %v3810_v13 }
  0x54   : > { %3582 = vmatprep.subr.bf16.mxu0 %v4059_v1 }
  0x56   : > { %3567 = vmatmul.mubr.msk.bf16.vlgmr.msra.gmra.mrb[8].mxu0 %vm756_vm1, %v4262_v5 }
  0x57   : > { %3583 = vmatpush3.bf16.msra.mxu0 %v3811_v14  ;;  %3590 = vmatprep.mubr.msk.bf16.mxu0 %vm4060_vm0, %v4059_v1 }
  0x58   : > { %3584 = vmatprep.subr.bf16.mxu0 %v4059_v1 }
  0x5b   : > { %3585 = vmatpush3.bf16.msra.mxu0 %v3812_v15 }
  0x5c   : > { %3586 = vmatprep.subr.bf16.mxu0 %v4059_v1 }
  0x5f   : > { %3587 = vmatpush3.bf16.msra.mxu0 %v3813_v16 }
  0x60   : > { %3588 = vmatprep.subr.bf16.mxu0 %v4059_v1 }
  0x63   : > { %3589 = vmatpush3.bf16.msra.mxu0 %v3814_v17 }
  0x64   : > { %3606 = vmatprep.subr.bf16.mxu0 %v4059_v1 }
  0x66   : > { %3591 = vmatmul.mubr.msk.bf16.vlgmr.msra.gmra.mrb[12].mxu0 %vm756_vm1, %v4262_v5 }
  0x67   : > { %3607 = vmatpush3.bf16.msra.mxu0 %v3815_v18  ;;  %3614 = vmatprep.mubr.msk.bf16.mxu0 %vm4060_vm0, %v4059_v1 }
  0x68   : > { %3608 = vmatprep.subr.bf16.mxu0 %v4059_v1 }
  0x6b   : > { %3609 = vmatpush3.bf16.msra.mxu0 %v3816_v19 }
  0x6c   : > { %3610 = vmatprep.subr.bf16.mxu0 %v4059_v1 }
  0x6f   : > { %3611 = vmatpush3.bf16.msra.mxu0 %v3817_v20 }
  0x70   : > { %3612 = vmatprep.subr.bf16.mxu0 %v4059_v1 }
  0x73   : > { %3613 = vmatpush3.bf16.msra.mxu0 %v3818_v21 }
  0x74   : > { %3618 = vmatprep.subr.bf16.mxu0 %v4059_v1 }
  0x76   : > { %3615 = vmatmul.mubr.msk.bf16.vlgmr.msra.gmra.mrb[16].mxu0 %vm756_vm1, %v4354_v24 }
  0x77   : > { %3620 = vmatprep.mubr.msk.bf16.mxu0 %vm4060_vm0, %v4059_v1 }
 0x109   : > { %v794_v26 = vpop.f32.mrb[0].mxu0 }
 0x10a   : > { %v795_v27 = vadd.f32 %v3137_v25, %v794_v26  ;;  %v3520_v28 = vpop.f32.mrb[1].mxu0  ;;  %v3827_v26 = vld [vmem:[%s4982_s6 + $0x20] sm:$0xff]  }
 0x10b   : > { %v797_v29 = vpop.f32.mrb[2].mxu0  ;;  %3547 = vmatpush3.bf16.msra.mxu1 %v3827_v26  ;;  %v3829_v28 = vld [vmem:[%s4982_s6 + $0x30] sm:$0xff]  }
 0x10c   : > { %v798_v30 = vadd.f32 %v3137_v25, %v797_v29  ;;  %v3521_v31 = vpop.f32.mrb[3].mxu0  ;;  %3548 = vmatprep.subr.bf16.mxu1 %v4059_v1  ;;  %v3830_v29 = vld [vmem:[%s4982_s6 + $0x38] sm:$0xff]  }
 0x10d   : > { %v3832_v31 = vld [vmem:[%s4982_s6 + $0x48] sm:$0xff]  }
 0x10e   : > { %v881_v32 = vpack.c.bf16 %v798_v30, %v795_v27  ;;  %v3828_v27 = vld [vmem:[%s4982_s6 + $0x28] sm:$0xff]   ;;  %v3831_v30 = vld [vmem:[%s4982_s6 + $0x40] sm:$0xff]  }
 0x10f   : > { %3549 = vmatpush3.bf16.msra.mxu1 %v3828_v27 }
 0x110   : > { %883 = vst.msk [vmem:[#allocation2] sm:$0xff] %vm882_vm2, %v881_v32  ;;  %3550 = vmatprep.subr.bf16.mxu1 %v4059_v1  ;;  %v3833_v32 = vld [vmem:[%s4982_s6 + $0x50] sm:$0xff]  }
 0x113   : > { %3551 = vmatpush3.bf16.msra.mxu1 %v3829_v28 }
 0x114   : > { %3552 = vmatprep.subr.bf16.mxu1 %v4059_v1 }
 0x117   : > { %v1481_v34 = vld [vmem:[#allocation2] sm:$0xff]  ;;  %3553 = vmatpush3.bf16.msra.mxu1 %v3830_v29 }
 0x118   : > { %v1489_v35 = vsel %vm882_vm2, %v1481_v34, 0  ;;  %3570 = vmatprep.subr.bf16.mxu1 %v4059_v1  ;;  %v3835_v34 = vld [vmem:[%s4982_s6 + $0x60] sm:$0xff]  }
 0x119   : > { %v961_v36 = vpop.f32.mrb[4].mxu0  ;;  %3619 = vmatpush3.bf16.xpose.msra.mxu0 %v1489_v35  ;;  %v3836_v35 = vld [vmem:[%s4982_s6 + $0x68] sm:$0xff]  }
 0x11a   : > { %v962_v37 = vadd.f32 %v3159_v33, %v961_v36  ;;  %v3544_v38 = vpop.f32.mrb[5].mxu0  ;;  %3630 = vmatprep.subr.bf16.mxu0 %v4059_v1  ;;  %3555 = vmatmul.mubr.msk.bf16.vlgmr.msra.gmra.mrb[4].mxu1 %vm756_vm1, %v4262_v5  ;;  %v3144_v36 = vld [vmem:[%s4983_s7] ss:$0 sm:$0xff] }
 0x11b   : > { %v964_v39 = vpop.f32.mrb[6].mxu0  ;;  %3571 = vmatpush3.bf16.msra.mxu1 %v3831_v30  ;;  %3578 = vmatprep.mubr.msk.bf16.mxu1 %vm4060_vm0, %v4059_v1 }
 0x11c   : > { %v965_v40 = vadd.f32 %v3159_v33, %v964_v39  ;;  %v3545_v41 = vpop.f32.mrb[7].mxu0  ;;  %3572 = vmatprep.subr.bf16.mxu1 %v4059_v1  ;;  %v3834_v33 = vld [vmem:[%s4982_s6 + $0x58] sm:$0xff]  }
 0x11e   : > { %v1050_v42 = vpack.c.bf16 %v965_v40, %v962_v37 }
 0x11f   : > { %3573 = vmatpush3.bf16.msra.mxu1 %v3832_v31 }
 0x120   : > { %1052 = vst.msk [vmem:[#allocation2 + $0x8] sm:$0xff] %vm882_vm2, %v1050_v42  ;;  %3574 = vmatprep.subr.bf16.mxu1 %v4059_v1 }
 0x122   : > { %v874_v37 = vpop.f32.mrb[0].mxu1 }
 0x123   : > { %3575 = vmatpush3.bf16.msra.mxu1 %v3833_v32  ;;  %v875_v38 = vadd.f32 %v3144_v36, %v874_v37  ;;  %v3532_v39 = vpop.f32.mrb[1].mxu1 }
 0x124   : > { %3576 = vmatprep.subr.bf16.mxu1 %v4059_v1  ;;  %v877_v40 = vpop.f32.mrb[2].mxu1 }
 0x125   : > { %v878_v41 = vadd.f32 %v3144_v36, %v877_v40  ;;  %v3533_v42 = vpop.f32.mrb[3].mxu1 }
 0x127   : > { %3577 = vmatpush3.bf16.msra.mxu1 %v3834_v33  ;;  %v1707_v28 = vld [vmem:[#allocation2 + $0x8] sm:$0xff]  ;;  %v3234_v33 = vld [vmem:[%s4983_s7 + $0x3] ss:$0 sm:$0xff] }
 0x128   : > { %3594 = vmatprep.subr.bf16.mxu1 %v4059_v1  ;;  %v1715_v31 = vsel %vm882_vm2, %v1707_v28, 0 }
 0x129   : > { %v1131_v44 = vpop.f32.mrb[8].mxu0 }
 0x12a   : > { %v1132_v45 = vadd.f32 %v3189_v43, %v1131_v44  ;;  %v3568_v46 = vpop.f32.mrb[9].mxu0  ;;  %3579 = vmatmul.mubr.msk.bf16.vlgmr.msra.gmra.mrb[8].mxu1 %vm756_vm1, %v4262_v5 }
 0x12b   : > { %v1134_v47 = vpop.f32.mrb[10].mxu0  ;;  %3595 = vmatpush3.bf16.msra.mxu1 %v3835_v34  ;;  %3602 = vmatprep.mubr.msk.bf16.mxu1 %vm4060_vm0, %v4059_v1 }
 0x12c   : > { %v1135_v48 = vadd.f32 %v3189_v43, %v1134_v47  ;;  %v3569_v49 = vpop.f32.mrb[11].mxu0  ;;  %3596 = vmatprep.subr.bf16.mxu1 %v4059_v1  ;;  %v884_v43 = vpack.c.bf16 %v878_v41, %v875_v38 }
 0x12e   : > { %v1220_v50 = vpack.c.bf16 %v1135_v48, %v1132_v45  ;;  %885 = vst.msk [vmem:[#allocation3] sm:$0xff] %vm882_vm2, %v884_v43 }
 0x12f   : > { %3597 = vmatpush3.bf16.msra.mxu1 %v3836_v35 }
 0x130   : > { %1222 = vst.msk [vmem:[#allocation2 + $0x10] sm:$0xff] %vm882_vm2, %v1220_v50  ;;  %3598 = vmatprep.subr.bf16.mxu1 %v4059_v1 }
 0x139   : > { %v1301_v52 = vpop.f32.mrb[12].mxu0 }
 0x13a   : > { %v1302_v53 = vadd.f32 %v3219_v51, %v1301_v52  ;;  %v3592_v54 = vpop.f32.mrb[13].mxu0 }
 0x13b   : > { %v1304_v55 = vpop.f32.mrb[14].mxu0  ;;  %v3837_v54 = vld [vmem:[%s4982_s6 + $0x70] sm:$0xff]  }
 0x13c   : > { %v1305_v56 = vadd.f32 %v3219_v51, %v1304_v55  ;;  %v3593_v57 = vpop.f32.mrb[15].mxu0  ;;  %3599 = vmatpush3.bf16.msra.mxu1 %v3837_v54  ;;  %v3838_v55 = vld [vmem:[%s4982_s6 + $0x78] sm:$0xff]   ;;  %s4989_s6 = sadd.s32 4294967295, %s4057_s25  }
 0x13d   : > { %3600 = vmatprep.subr.bf16.mxu1 %v4059_v1 }
 0x13e   : > { %v1390_v58 = vpack.c.bf16 %v1305_v56, %v1302_v53  ;;  %v1482_v56 = vld [vmem:[#allocation3] sm:$0xff] }
 0x140   : > { %1392 = vst.msk [vmem:[#allocation2 + $0x18] sm:$0xff] %vm882_vm2, %v1390_v58  ;;  %3601 = vmatpush3.bf16.msra.mxu1 %v3838_v55 }
 0x141   : > { %3624 = vmatprep.subr.bf16.mxu1 %v4059_v1 }
 0x143   : > { %3603 = vmatmul.mubr.msk.bf16.vlgmr.msra.gmra.mrb[12].mxu1 %vm756_vm1, %v4262_v5  ;;  %v3174_v5 = vld [vmem:[%s4983_s7 + $0x1] ss:$0 sm:$0xff] }
 0x144   : > { %3625 = vmatpush3.bf16.msra.mxu1 %v1482_v56  ;;  %3626 = vmatprep.mubr.msk.bf16.mxu1 %vm4060_vm0, %v4059_v1 }
 0x145   : > { %3642 = vmatprep.subr.bf16.mxu1 %v4059_v1 }
 0x149   : > { %v1474_v60 = vpop.f32.mrb[16].mxu0 }
 0x14a   : > { %v3616_v61 = vpop.f32.mrb[17].mxu0  ;;  %v1475_v63 = vadd.f32 %v3240_v59, %v1474_v60 }
 0x14b   : > { %v1477_v62 = vpop.f32.mrb[18].mxu0 }
 0x14c   : > { %v1478_v0 = vadd.f32 %v3240_v59, %v1477_v62  ;;  %v3617_v2 = vpop.f32.mrb[19].mxu0  ;;  %v3261_v59 = vld [vmem:[%s4981_s27 + $0x1] ss:$0 sm:$0xff] }
 0x14e   : > { %v1483_v3 = vpack.c.bf16 %v1478_v0, %v1475_v63 }
 0x150   : > { %3621 = vmatmul.mubr.msk.bf16.vlgmr.msra.gmra.mrb[20].mxu0 %vm882_vm2, %v1483_v3 }
 0x151   : > { %3638 = vmatprep.mubr.msk.bf16.mxu0 %vm4060_vm0, %v4059_v1  ;;  %3631 = vmatpush3.bf16.msra.mxu0 %v3823_v6 }
 0x152   : > { %3632 = vmatprep.subr.bf16.mxu0 %v4059_v1 }
 0x155   : > { %3633 = vmatpush3.bf16.msra.mxu0 %v3824_v8 }
 0x156   : > { %3634 = vmatprep.subr.bf16.mxu0 %v4059_v1 }
 0x159   : > { %3635 = vmatpush3.bf16.msra.mxu0 %v3825_v10  ;;  %v3204_v10 = vld [vmem:[%s4983_s7 + $0x2] ss:$0 sm:$0xff]  ;;  %s4777_s7 = sand.u32 1, %s4989_s6   ;;  %s3923_s6 = sshll.u32 %s4062_s5, 4  ;;  %s3924_s6 = int_to_ptr.vmem [resolvable:$false] %s3923_s6 }
 0x15a   : > { %3636 = vmatprep.subr.bf16.mxu0 %v4059_v1  ;;  %s2911_s2 = scalar_lea.sflag [#allocation7], %s4777_s7  ;;  %p3926_p1 = scmp.lt.s32.totalorder %s4788_s26, %s3924_s6 }
 0x15d   : > { %3637 = vmatpush3.bf16.msra.mxu0 %v3826_v12 }
 0x15e   : > { %3654 = vmatprep.subr.bf16.mxu0 %v4059_v1 }
 0x160   : > { %3639 = vmatmul.mubr.msk.bf16.vlgmr.msra.gmra.mrb[24].mxu0 %vm756_vm1, %v4354_v24 }
 0x161   : > { %3656 = vmatprep.mubr.msk.bf16.mxu0 %vm4060_vm0, %v4059_v1 }
 0x1ed   : > { %v1043_v2 = vpop.f32.mrb[4].mxu1 }
 0x1ee   : > { %v1044_v3 = vadd.f32 %v3174_v5, %v1043_v2  ;;  %v3556_v4 = vpop.f32.mrb[5].mxu1  ;;  %v3840_v2 = vld [vmem:[%s4985_s8 + $0x8] sm:$0xff]  }
 0x1ef   : > { %v1046_v6 = vpop.f32.mrb[6].mxu1  ;;  %3655 = vmatpush3.bf16.msra.mxu0 %v3840_v2 }
 0x1f0   : > { %v1047_v7 = vadd.f32 %v3174_v5, %v1046_v6  ;;  %v3557_v8 = vpop.f32.mrb[7].mxu1  ;;  %3666 = vmatprep.subr.bf16.mxu0 %v4059_v1 }
 0x1f2   : > { %v1053_v9 = vpack.c.bf16 %v1047_v7, %v1044_v3 }
 0x1f4   : > { %1055 = vst.msk [vmem:[#allocation3 + $0x8] sm:$0xff] %vm882_vm2, %v1053_v9 }
 0x1fb   : > { %v1709_v32 = vld [vmem:[#allocation3 + $0x8] sm:$0xff] }
 0x1fd   : > { %v1213_v11 = vpop.f32.mrb[8].mxu1 }
 0x1fe   : > { %v1214_v12 = vadd.f32 %v3204_v10, %v1213_v11  ;;  %v3839_v11 = vld [vmem:[%s4985_s8] sm:$0xff]  }
 0x223   : > { %v1525_v13 = vpop.f32.mrb[20].mxu0 }
 0x224   : > { %v1532_v14 = vmul.f32 0.25, %v1525_v13  ;;  %v3622_v15 = vpop.f32.mrb[21].mxu0  ;;  %v3580_v13 = vpop.f32.mrb[9].mxu1 }
 0x225   : > { %v1528_v16 = vpop.f32.mrb[22].mxu0 }
 0x226   : > { %v3385_v17 = vpack.c.bf16 %v1532_v14, %v1532_v14  ;;  %v1533_v18 = vmul.f32 0.25, %v1528_v16  ;;  %v3623_v19 = vpop.f32.mrb[23].mxu0  ;;  %v1545_v20 = vsel %vm882_vm2, %v1532_v14, -inf }
 0x227   : > { %1546 = vmax.xlane.f32.xlu0 %v1545_v20 }
 0x228   : > { %1543 = vst.msk [vmem:[%s4432_s18] sm:$0xf] %vm1542_vm3, %v3385_v17  ;;  %v3386_v21 = vpack.c.bf16 %v1533_v18, %v1533_v18  ;;  %v1548_v25 = vsel %vm882_vm2, %v1533_v18, -inf }
 0x22a   : > { %1544 = vst.msk [vmem:[%s4432_s18 + $0x4] sm:$0xf] %vm1542_vm3, %v3386_v21 }
 0x22b   : > { %1549 = vmax.xlane.f32.xlu0 %v1548_v25 }
 0x233   : > { %v1699_v57 = vpop.f32.mrb[24].mxu0 }
 0x234   : > { %v3640_v58 = vpop.f32.mrb[25].mxu0  ;;  %v1700_v61 = vadd.f32 %v3261_v59, %v1699_v57 }
 0x235   : > { %v1702_v60 = vpop.f32.mrb[26].mxu0 }
 0x236   : > { %v1703_v62 = vadd.f32 %v3261_v59, %v1702_v60  ;;  %v3641_v63 = vpop.f32.mrb[27].mxu0 }
 0x238   : > { %v1710_v0 = vpack.c.bf16 %v1703_v62, %v1700_v61 }
 0x2b4   : > { %v1547_v44 = vpop.xlane.xlu0 %1546 }
 0x2b5   : > { %v1551_v45 = vsub.f32 %v1532_v14, %v1547_v44  ;;  %v1216_v14 = vpop.f32.mrb[10].mxu1 }
 0x2b6   : > { %v1217_v15 = vadd.f32 %v3204_v10, %v1216_v14  ;;  %v3581_v16 = vpop.f32.mrb[11].mxu1  ;;  %v2035_v14 = vld [vmem:[#allocation2 + $0x10] sm:$0xff] }
 0x2b7   : > { %v1553_v46 = vmul.f32 1.442695, %v1551_v45  ;;  %v1383_v34 = vpop.f32.mrb[12].mxu1 }
 0x2b8   : > { %v1550_v47 = vpop.xlane.xlu0 %1549  ;;  %v1223_v17 = vpack.c.bf16 %v1217_v15, %v1214_v12  ;;  %v1384_v35 = vadd.f32 %v3234_v33, %v1383_v34  ;;  %v3604_v36 = vpop.f32.mrb[13].mxu1  ;;  %v2043_v15 = vsel %vm882_vm2, %v2035_v14, 0 }
 0x2b9   : > { %3879 = vpow2.f32 %v1553_v46  ;;  %v1552_v48 = vsub.f32 %v1533_v18, %v1550_v47  ;;  %v1386_v37 = vpop.f32.mrb[14].mxu1 }
 0x2ba   : > { %1225 = vst.msk [vmem:[#allocation3 + $0x10] sm:$0xff] %vm882_vm2, %v1223_v17  ;;  %v1387_v38 = vadd.f32 %v3234_v33, %v1386_v37  ;;  %v3605_v39 = vpop.f32.mrb[15].mxu1 }
 0x2bb   : > { %v1555_v49 = vmul.f32 1.442695, %v1552_v48 }
 0x2bc   : > { %v1393_v40 = vpack.c.bf16 %v1387_v38, %v1384_v35  ;;  %v3292_v38 = vld [vmem:[%s4981_s27 + $0x2] ss:$0 sm:$0xff] }
 0x2bd   : > { %3881 = vpow2.f32 %v1555_v49 }
 0x2be   : > { %1395 = vst.msk [vmem:[#allocation3 + $0x18] sm:$0xff] %vm882_vm2, %v1393_v40 }
 0x2c3   : > { %v3880_v50 = vpop.eup %3879 }
 0x2c4   : > { %v1557_v51 = vsel %vm882_vm2, %v3880_v50, 0.0 }
 0x2c5   : > { %1558 = vadd.xlane.f32.xlu1 %v1557_v51 }
 0x2c7   : > { %v3882_v52 = vpop.eup %3881 }
 0x2c8   : > { %v1560_v53 = vsel %vm882_vm2, %v3882_v52, 0.0 }
 0x2c9   : > { %1561 = vadd.xlane.f32.xlu1 %v1560_v53 }
 0x352   : > { %v1559_v18 = vpop.xlane.xlu1 %1558 }
 0x353   : > { %3883 = vrcp.f32 %v1559_v18 }
 0x356   : > { %v1562_v19 = vpop.xlane.xlu1 %1561 }
 0x357   : > { %3885 = vrcp.f32 %v1562_v19  ;;  %v3841_v19 = vld [vmem:[%s4977_s29 + $0x40] sm:$0xff]  }
 0x35d   : > { %v3884_v20 = vpop.eup %3883 }
 0x35e   : > { %v1565_v21 = vmul.f32 %v3884_v20, %v3880_v50 }
 0x360   : > { %v3387_v25 = vpack.c.bf16 %v1565_v21, %v1565_v21 }
 0x361   : > { %v3886_v26 = vpop.eup %3885 }
 0x362   : > { %1575 = vst.msk [vmem:[%s4519_s23] sm:$0xf] %vm1542_vm3, %v3387_v25  ;;  %v1566_v27 = vmul.f32 %v3886_v26, %v3882_v52  ;;  %v3842_v25 = vld [vmem:[%s4977_s29 + $0x48] sm:$0xff]  }
 0x364   : > { %v3388_v29 = vpack.c.bf16 %v1566_v27, %v1566_v27  ;;  %v1567_v30 = vpack.c.bf16 %v1566_v27, %v1565_v21 }
 0x366   : > { %1576 = vst.msk [vmem:[%s4519_s23 + $0x4] sm:$0xf] %vm1542_vm3, %v3388_v29  ;;  %3627 = vmatmul.mubr.msk.bf16.vlgmr.msra.gmra.mrb[16].mxu1 %vm882_vm2, %v1567_v30  ;;  %v3843_v29 = vld [vmem:[%s4977_s29 + $0x50] sm:$0xff]  }
 0x367   : > { %3643 = vmatpush3.bf16.xpose.msra.mxu1 %v1715_v31  ;;  %3644 = vmatprep.mubr.msk.bf16.mxu1 %vm4060_vm0, %v4059_v1  ;;  %v3844_v31 = vld [vmem:[%s4977_s29 + $0x58] sm:$0xff]  }
 0x368   : > { %3648 = vmatprep.subr.bf16.mxu1 %v4059_v1 }
 0x36e   : > { %3645 = vmatmul.mubr.msk.bf16.vlgmr.msra.gmra.mrb[20].mxu1 %vm882_vm2, %v1710_v0 }
 0x36f   : > { %3649 = vmatpush3.bf16.msra.mxu1 %v1709_v32  ;;  %3650 = vmatprep.mubr.msk.bf16.mxu1 %vm4060_vm0, %v4059_v1 }
 0x370   : > { %3660 = vmatprep.subr.bf16.mxu1 %v4059_v1 }
 0x439   : > { %v1614_v41 = vpop.f32.mrb[16].mxu1 }
 0x43a   : > { %v3628_v42 = vpop.f32.mrb[17].mxu1 }
 0x43b   : > { %v1617_v43 = vpop.f32.mrb[18].mxu1 }
 0x43c   : > { %v1621_v44 = vpack.c.bf16 %v1617_v43, %v1614_v41  ;;  %v3629_v45 = vpop.f32.mrb[19].mxu1 }
 0x441   : > { %v1751_v46 = vpop.f32.mrb[20].mxu1 }
 0x442   : > { %v1758_v47 = vmul.f32 0.25, %v1751_v46  ;;  %v3646_v48 = vpop.f32.mrb[21].mxu1  ;;  %v2037_v46 = vld [vmem:[#allocation3 + $0x10] sm:$0xff] }
 0x443   : > { %v1754_v49 = vpop.f32.mrb[22].mxu1 }
 0x444   : > { %v3389_v50 = vpack.c.bf16 %v1758_v47, %v1758_v47  ;;  %v1759_v51 = vmul.f32 0.25, %v1754_v49  ;;  %v3647_v52 = vpop.f32.mrb[23].mxu1  ;;  %v1771_v53 = vsel %vm882_vm2, %v1758_v47, -inf }
 0x445   : > { %1772 = vmax.xlane.f32.xlu0 %v1771_v53 }
 0x446   : > { %3270 = vst.msk [vmem:[%s4432_s18 + $0x8] sm:$0xf] %vm1542_vm3, %v3389_v50  ;;  %v3390_v54 = vpack.c.bf16 %v1759_v51, %v1759_v51  ;;  %v1774_v55 = vsel %vm882_vm2, %v1759_v51, -inf }
 0x447   : > { %1775 = vmax.xlane.f32.xlu1 %v1774_v55 }
 0x448   : > { %3271 = vst.msk [vmem:[%s4432_s18 + $0xc] sm:$0xf] %vm1542_vm3, %v3390_v54 }
 0x4d2   : > { %v1773_v56 = vpop.xlane.xlu0 %1772 }
 0x4d3   : > { %v1777_v57 = vsub.f32 %v1758_v47, %v1773_v56 }
 0x4d4   : > { %v1776_v58 = vpop.xlane.xlu1 %1775 }
 0x4d5   : > { %v1779_v59 = vmul.f32 1.442695, %v1777_v57  ;;  %v1778_v60 = vsub.f32 %v1759_v51, %v1776_v58 }
 0x4d7   : > { %3887 = vpow2.f32 %v1779_v59  ;;  %v1781_v61 = vmul.f32 1.442695, %v1778_v60 }
 0x4d9   : > { %3889 = vpow2.f32 %v1781_v61 }
 0x4e1   : > { %v3888_v62 = vpop.eup %3887 }
 0x4e2   : > { %v1783_v63 = vsel %vm882_vm2, %v3888_v62, 0.0 }
 0x4e3   : > { %v3890_v0 = vpop.eup %3889  ;;  %1784 = vadd.xlane.f32.xlu0 %v1783_v63 }
 0x4e4   : > { %v1786_v5 = vsel %vm882_vm2, %v3890_v0, 0.0 }
 0x4e5   : > { %1787 = vadd.xlane.f32.xlu1 %v1786_v5 }
 0x570   : > { %v1785_v3 = vpop.xlane.xlu0 %1784 }
 0x571   : > { %3891 = vrcp.f32 %v1785_v3  ;;  %v3849_v3 = vld [vmem:[%s4985_s8 + $0x10] sm:$0xff]  }
 0x572   : > { %v1788_v4 = vpop.xlane.xlu1 %1787 }
 0x573   : > { %3893 = vrcp.f32 %v1788_v4 }
 0x57b   : > { %v3892_v6 = vpop.eup %3891 }
 0x57c   : > { %v1791_v7 = vmul.f32 %v3892_v6, %v3888_v62 }
 0x57d   : > { %v3894_v8 = vpop.eup %3893 }
 0x57e   : > { %v3391_v9 = vpack.c.bf16 %v1791_v7, %v1791_v7  ;;  %v1792_v10 = vmul.f32 %v3894_v8, %v3890_v0 }
 0x580   : > { %3274 = vst.msk [vmem:[%s4519_s23 + $0x8] sm:$0xf] %vm1542_vm3, %v3391_v9  ;;  %v3392_v12 = vpack.c.bf16 %v1792_v10, %v1792_v10  ;;  %v1793_v13 = vpack.c.bf16 %v1792_v10, %v1791_v7 }
 0x582   : > { %3275 = vst.msk [vmem:[%s4519_s23 + $0xc] sm:$0xf] %vm1542_vm3, %v3392_v12  ;;  %3651 = vmatmul.mubr.msk.bf16.vlgmr.msra.gmra.mrb[24].mxu1 %vm882_vm2, %v1793_v13  ;;  %v3845_v12 = vld [vmem:[%s4977_s29 + $0x60] sm:$0xff]  }
 0x583   : > { %3661 = vmatpush3.bf16.msra.mxu1 %v3839_v11  ;;  %3662 = vmatprep.mubr.msk.bf16.mxu1 %vm4060_vm0, %v4059_v1 }
 0x584   : > { %3678 = vmatprep.subr.bf16.mxu1 %v4059_v1 }
 0x58a   : > { %3663 = vmatmul.mubr.msk.bf16.vlgmr.msra.gmra.mrb[28].mxu1 %vm882_vm2, %v1621_v44 }
 0x58b   : > { %3680 = vmatprep.mubr.msk.bf16.mxu1 %vm4060_vm0, %v4059_v1 }
 0x58c   : > { %3679 = vmatpush3.bf16.xpose.msra.mxu1 %v2043_v15  ;;  %v3846_v15 = vld [vmem:[%s4977_s29 + $0x68] sm:$0xff]  }
 0x58d   : > { %3684 = vmatprep.subr.bf16.mxu1 %v4059_v1 }
 0x655   : > { %v1841_v16 = vpop.f32.mrb[24].mxu1 }
 0x656   : > { %v3652_v17 = vpop.f32.mrb[25].mxu1 }
 0x657   : > { %v1844_v18 = vpop.f32.mrb[26].mxu1  ;;  %v3848_v17 = vld [vmem:[%s4977_s29 + $0x78] sm:$0xff]  }
 0x658   : > { %v1848_v20 = vpack.c.bf16 %v1844_v18, %v1841_v16  ;;  %v3653_v21 = vpop.f32.mrb[27].mxu1  ;;  %v3847_v16 = vld [vmem:[%s4977_s29 + $0x70] sm:$0xff]  }
 0x659   : > { %v2315_v21 = vld [vmem:[#allocation2 + $0x18] sm:$0xff] }
 0x65a   : > { %3657 = vmatmul.mubr.msk.bf16.vlgmr.msra.gmra.mrb[28].mxu0 %vm882_vm2, %v1848_v20 }
 0x65b   : > { %3667 = vmatpush3.bf16.msra.mxu0 %v3841_v19  ;;  %3674 = vmatprep.mubr.msk.bf16.mxu0 %vm4060_vm0, %v4059_v1 }
 0x65c   : > { %3668 = vmatprep.subr.bf16.mxu0 %v4059_v1 }
 0x65d   : > { %v1945_v26 = vpop.f32.mrb[28].mxu1 }
 0x65e   : > { %v3664_v27 = vpop.f32.mrb[29].mxu1 }
 0x65f   : > { %3669 = vmatpush3.bf16.msra.mxu0 %v3842_v25  ;;  %v1948_v28 = vpop.f32.mrb[30].mxu1  ;;  %v2323_v27 = vsel %vm882_vm2, %v2315_v21, 0 }
 0x660   : > { %v3665_v30 = vpop.f32.mrb[31].mxu1  ;;  %3670 = vmatprep.subr.bf16.mxu0 %v4059_v1 }
 0x663   : > { %3671 = vmatpush3.bf16.msra.mxu0 %v3843_v29 }
 0x664   : > { %3672 = vmatprep.subr.bf16.mxu0 %v4059_v1 }
 0x667   : > { %3673 = vmatpush3.bf16.msra.mxu0 %v3844_v31 }
 0x668   : > { %3690 = vmatprep.subr.bf16.mxu0 %v4059_v1 }
 0x66a   : > { %3675 = vmatmul.mubr.msk.bf16.vlgmr.msra.gmra.mrb[32].mxu0 %vm756_vm1, %v4354_v24 }
 0x66b   : > { %3692 = vmatprep.mubr.msk.bf16.mxu0 %vm4060_vm0, %v4059_v1  ;;  %3691 = vmatpush3.bf16.msra.mxu0 %v3849_v3 }
 0x66c   : > { %3708 = vmatprep.subr.bf16.mxu0 %v4059_v1 }
 0x72d   : > { %v1895_v32 = vpop.f32.mrb[28].mxu0 }
 0x72e   : > { %v4589_v33 = vadd.f32 %v1945_v26, %v1895_v32  ;;  %v3658_v34 = vpop.f32.mrb[29].mxu0 }
 0x72f   : > { %v1898_v35 = vpop.f32.mrb[30].mxu0 }
 0x730   : > { %v4591_v36 = vadd.f32 %v1948_v28, %v1898_v35  ;;  %v3659_v37 = vpop.f32.mrb[31].mxu0 }
 0x731   : > { %v2317_v37 = vld [vmem:[#allocation3 + $0x18] sm:$0xff] }
 0x73d   : > { %v2027_v39 = vpop.f32.mrb[32].mxu0 }
 0x73e   : > { %v3676_v40 = vpop.f32.mrb[33].mxu0  ;;  %v2028_v42 = vadd.f32 %v3292_v38, %v2027_v39 }
 0x73f   : > { %v2030_v41 = vpop.f32.mrb[34].mxu0 }
 0x740   : > { %v2031_v43 = vadd.f32 %v3292_v38, %v2030_v41  ;;  %v3677_v44 = vpop.f32.mrb[35].mxu0 }
 0x742   : > { %v2038_v45 = vpack.c.bf16 %v2031_v43, %v2028_v42 }
 0x744   : > { %3681 = vmatmul.mubr.msk.bf16.vlgmr.msra.gmra.mrb[32].mxu1 %vm882_vm2, %v2038_v45 }
 0x745   : > { %3685 = vmatpush3.bf16.msra.mxu1 %v2037_v46  ;;  %3686 = vmatprep.mubr.msk.bf16.mxu1 %vm4060_vm0, %v4059_v1 }
 0x746   : > { %3696 = vmatprep.subr.bf16.mxu1 %v4059_v1 }
 0x817   : > { %v2079_v47 = vpop.f32.mrb[32].mxu1 }
 0x818   : > { %v2086_v48 = vmul.f32 0.25, %v2079_v47  ;;  %v3682_v49 = vpop.f32.mrb[33].mxu1 }
 0x819   : > { %v2082_v50 = vpop.f32.mrb[34].mxu1 }
 0x81a   : > { %v3393_v51 = vpack.c.bf16 %v2086_v48, %v2086_v48  ;;  %v2087_v52 = vmul.f32 0.25, %v2082_v50  ;;  %v3683_v53 = vpop.f32.mrb[35].mxu1  ;;  %v2099_v54 = vsel %vm882_vm2, %v2086_v48, -inf }
 0x81b   : > { %2100 = vmax.xlane.f32.xlu0 %v2099_v54 }
 0x81c   : > { %3301 = vst.msk [vmem:[%s4432_s18 + $0x10] sm:$0xf] %vm1542_vm3, %v3393_v51  ;;  %v3394_v55 = vpack.c.bf16 %v2087_v52, %v2087_v52  ;;  %v2102_v56 = vsel %vm882_vm2, %v2087_v52, -inf }
 0x81d   : > { %2103 = vmax.xlane.f32.xlu1 %v2102_v56 }
 0x81e   : > { %3302 = vst.msk [vmem:[%s4432_s18 + $0x14] sm:$0xf] %vm1542_vm3, %v3394_v55 }
 0x8a8   : > { %v2101_v57 = vpop.xlane.xlu0 %2100 }
 0x8a9   : > { %v2105_v58 = vsub.f32 %v2086_v48, %v2101_v57 }
 0x8aa   : > { %v2104_v59 = vpop.xlane.xlu1 %2103 }
 0x8ab   : > { %v2107_v60 = vmul.f32 1.442695, %v2105_v58  ;;  %v2106_v61 = vsub.f32 %v2087_v52, %v2104_v59 }
 0x8ad   : > { %3895 = vpow2.f32 %v2107_v60  ;;  %v2109_v62 = vmul.f32 1.442695, %v2106_v61  ;;  %v3850_v61 = vld [vmem:[%s4985_s8 + $0x18] sm:$0xff]   ;;  %s4953_s8 = sshll.u32 %s4049_s24, 9 }
 0x8ae   : > { %s4785_s3 = scalar_lea.hbm %s4939_s19, %s4953_s8 }
 0x8af   : > { %3897 = vpow2.f32 %v2109_v62 }
 0x8b7   : > { %v3896_v63 = vpop.eup %3895 }
 0x8b8   : > { %v2111_v0 = vsel %vm882_vm2, %v3896_v63, 0.0 }
 0x8b9   : > { %v3898_v5 = vpop.eup %3897  ;;  %2112 = vadd.xlane.f32.xlu0 %v2111_v0 }
 0x8ba   : > { %v2114_v2 = vsel %vm882_vm2, %v3898_v5, 0.0 }
 0x8bb   : > { %2115 = vadd.xlane.f32.xlu1 %v2114_v2 }
 0x946   : > { %v2113_v4 = vpop.xlane.xlu0 %2112 }
 0x947   : > { %3899 = vrcp.f32 %v2113_v4 }
 0x948   : > { %v2116_v6 = vpop.xlane.xlu1 %2115 }
 0x949   : > { %3901 = vrcp.f32 %v2116_v6 }
 0x951   : > { %v3900_v7 = vpop.eup %3899 }
 0x952   : > { %v2119_v8 = vmul.f32 %v3900_v7, %v3896_v63 }
 0x953   : > { %v3902_v9 = vpop.eup %3901 }
 0x954   : > { %v3395_v10 = vpack.c.bf16 %v2119_v8, %v2119_v8  ;;  %v2120_v11 = vmul.f32 %v3902_v9, %v3898_v5 }
 0x956   : > { %3305 = vst.msk [vmem:[%s4519_s23 + $0x10] sm:$0xf] %vm1542_vm3, %v3395_v10  ;;  %v3396_v13 = vpack.c.bf16 %v2120_v11, %v2120_v11  ;;  %v2121_v14 = vpack.c.bf16 %v2120_v11, %v2119_v8 }
 0x958   : > { %3306 = vst.msk [vmem:[%s4519_s23 + $0x14] sm:$0xf] %vm1542_vm3, %v3396_v13  ;;  %3687 = vmatmul.mubr.msk.bf16.vlgmr.msra.gmra.mrb[36].mxu1 %vm882_vm2, %v2121_v14  ;;  %v3341_v14 = vld [vmem:[%s4986_s9] ss:$0 sm:$0xff]  ;;  %s3925_s9 = scalar_lea.vmem %s3924_s6, 1024 }
 0x959   : > { %3697 = vmatpush3.bf16.msra.mxu1 %v3845_v12  ;;  %3704 = vmatprep.mubr.msk.bf16.mxu1 %vm4060_vm0, %v4059_v1  ;;  %p3927_p2 = scmp.lt.s32.totalorder %s3925_s9, %s3919_s0 }
 0x95a   : > { %3698 = vmatprep.subr.bf16.mxu1 %v4059_v1 }
 0x95b   : > { %p3928_p3 = por %p3927_p2, %p3926_p1 }
 0x95d   : > { %3699 = vmatpush3.bf16.msra.mxu1 %v3846_v15  ;;  %p3929_p5 = pnand %p3928_p3, %p3922_p0 }
 0x95e   : > { %3700 = vmatprep.subr.bf16.mxu1 %v4059_v1 }
 0x961   : > { %3701 = vmatpush3.bf16.msra.mxu1 %v3847_v16 }
 0x962   : > { %3702 = vmatprep.subr.bf16.mxu1 %v4059_v1 }
 0x965   : > { %3703 = vmatpush3.bf16.msra.mxu1 %v3848_v17 }
 0x966   : > { %3720 = vmatprep.subr.bf16.mxu1 %v4059_v1 }
 0x968   : > { %3705 = vmatmul.mubr.msk.bf16.vlgmr.msra.gmra.mrb[40].mxu1 %vm756_vm1, %v4354_v24  ;;  %v3321_v24 = vld [vmem:[%s4981_s27 + $0x3] ss:$0 sm:$0xff] }
 0x969   : > { %3722 = vmatprep.mubr.msk.bf16.mxu1 %vm4060_vm0, %v4059_v1  ;;  %3721 = vmatpush3.bf16.msra.mxu1 %v3850_v61 }
 0xa2b   : > { %v2169_v18 = vpop.f32.mrb[36].mxu1 }
 0xa2c   : > { %v3688_v19 = vpop.f32.mrb[37].mxu1 }
 0xa2d   : > { %v2172_v20 = vpop.f32.mrb[38].mxu1 }
 0xa2e   : > { %v2176_v25 = vpack.c.bf16 %v2172_v20, %v2169_v18  ;;  %v3689_v26 = vpop.f32.mrb[39].mxu1 }
 0xa30   : > { %3693 = vmatmul.mubr.msk.bf16.vlgmr.msra.gmra.mrb[36].mxu0 %vm882_vm2, %v2176_v25 }
 0xa31   : > { %3709 = vmatpush3.bf16.xpose.msra.mxu0 %v2323_v27  ;;  %3710 = vmatprep.mubr.msk.bf16.mxu0 %vm4060_vm0, %v4059_v1 }
 0xa32   : > { %3714 = vmatprep.subr.bf16.mxu0 %v4059_v1 }
 0xa3b   : > { %v2307_v28 = vpop.f32.mrb[40].mxu1 }
 0xa3c   : > { %v3706_v29 = vpop.f32.mrb[41].mxu1  ;;  %v2308_v31 = vadd.f32 %v3321_v24, %v2307_v28 }
 0xa3d   : > { %v2310_v30 = vpop.f32.mrb[42].mxu1 }
 0xa3e   : > { %v2311_v32 = vadd.f32 %v3321_v24, %v2310_v30  ;;  %v3707_v34 = vpop.f32.mrb[43].mxu1 }
 0xa40   : > { %v2318_v35 = vpack.c.bf16 %v2311_v32, %v2308_v31 }
 0xa42   : > { %3711 = vmatmul.mubr.msk.bf16.vlgmr.msra.gmra.mrb[40].mxu0 %vm882_vm2, %v2318_v35 }
 0xa43   : > { %3715 = vmatpush3.bf16.msra.mxu0 %v2317_v37  ;;  %3716 = vmatprep.mubr.msk.bf16.mxu0 %vm4060_vm0, %v4059_v1 }
 0xb03   : > { %v2223_v38 = vpop.f32.mrb[36].mxu0 }
 0xb04   : > { %v2230_v39 = vadd.f32 %v2223_v38, %v4589_v33  ;;  %v3694_v40 = vpop.f32.mrb[37].mxu0 }
 0xb05   : > { %v2226_v41 = vpop.f32.mrb[38].mxu0  ;;  %v3856_v40 = vld [vmem:[%s4932_s12 + $0x14] ss:$8 sps:$4 sm:$0xff]  }
 0xb06   : > { %v2231_v42 = vadd.f32 %v2226_v41, %v4591_v36  ;;  %v3695_v43 = vpop.f32.mrb[39].mxu0  ;;  %v3854_v41 = vld [vmem:[%s4932_s12 + $0x10] ss:$8 sps:$4 sm:$0xff]  }
 0xb07   : > { %v3857_v43 = vld [vmem:[%s4932_s12 + $0x20] ss:$8 sps:$4 sm:$0xff]  }
 0xb15   : > { %v2359_v44 = vpop.f32.mrb[40].mxu0 }
 0xb16   : > { %v2366_v45 = vmul.f32 0.25, %v2359_v44  ;;  %v3712_v46 = vpop.f32.mrb[41].mxu0  ;;  %v3860_v44 = vld [vmem:[%s4932_s12 + $0x30] ss:$8 sps:$4 sm:$0xff]  }
 0xb17   : > { %v2362_v47 = vpop.f32.mrb[42].mxu0  ;;  %v4061_v46 = vmov 0  }
 0xb18   : > { %v3397_v48 = vpack.c.bf16 %v2366_v45, %v2366_v45  ;;  %v2367_v49 = vmul.f32 0.25, %v2362_v47  ;;  %v3713_v50 = vpop.f32.mrb[43].mxu0  ;;  %v2379_v51 = vsel %vm882_vm2, %v2366_v45, -inf  ;;  %v3863_v47 = vld [vmem:[%s4934_s14 + $0x40] sm:$0xff]  }
 0xb19   : > { %2380 = vmax.xlane.f32.xlu0 %v2379_v51  ;;  %3488 = vmatprep.subr.bf16.mxu1 %v3863_v47  ;;  %v3866_v50 = vld [vmem:[%s4934_s14 + $0x8] sm:$0xff]   ;;  %v3867_v51 = vld [vmem:[%s4934_s14 + $0x50] sm:$0xff]  }
 0xb1a   : > { %3330 = vst.msk [vmem:[%s4432_s18 + $0x18] sm:$0xf] %vm1542_vm3, %v3397_v48  ;;  %v3398_v1 = vpack.c.bf16 %v2367_v49, %v2367_v49  ;;  %v2382_v33 = vsel %vm882_vm2, %v2367_v49, -inf  ;;  %v3864_v48 = vld [vmem:[%s4934_s14] sm:$0xff]  }
 0xb1b   : > { %2383 = vmax.xlane.f32.xlu1 %v2382_v33  ;;  %v3869_v33 = vld [vmem:[%s4934_s14 + $0x58] sm:$0xff]  }
 0xb1c   : > { %3331 = vst.msk [vmem:[%s4432_s18 + $0x1c] sm:$0xf] %vm1542_vm3, %v3398_v1  ;;  %v3868_v1 = vld [vmem:[%s4934_s14 + $0x10] sm:$0xff]  }
 0xba6   : > { %v2381_v36 = vpop.xlane.xlu0 %2380 }
 0xba7   : > { %v2385_v52 = vsub.f32 %v2366_v45, %v2381_v36  ;;  %v3862_v45 = vld [vmem:[%s4932_s12 + $0x34] ss:$8 sps:$4 sm:$0xff]  }
 0xba8   : > { %v2384_v53 = vpop.xlane.xlu1 %2383  ;;  %v3870_v36 = vld [vmem:[%s4934_s14 + $0x18] sm:$0xff]  }
 0xba9   : > { %v2387_v54 = vmul.f32 1.442695, %v2385_v52  ;;  %v2386_v55 = vsub.f32 %v2367_v49, %v2384_v53  ;;  %v3865_v49 = vld [vmem:[%s4934_s14 + $0x48] sm:$0xff]   ;;  %v3871_v52 = vld [vmem:[%s4934_s14 + $0x60] sm:$0xff]  }
 0xbaa   : > { %v3872_v53 = vld [vmem:[%s4934_s14 + $0x20] sm:$0xff]  }
 0xbab   : > { %3903 = vpow2.f32 %v2387_v54  ;;  %v2389_v56 = vmul.f32 1.442695, %v2386_v55  ;;  %v3873_v54 = vld [vmem:[%s4934_s14 + $0x68] sm:$0xff]  }
 0xbad   : > { %3905 = vpow2.f32 %v2389_v56 }
 0xbb5   : > { %v3904_v57 = vpop.eup %3903 }
 0xbb6   : > { %v2391_v58 = vsel %vm882_vm2, %v3904_v57, 0.0 }
 0xbb7   : > { %v3906_v59 = vpop.eup %3905  ;;  %2392 = vadd.xlane.f32.xlu0 %v2391_v58 }
 0xbb8   : > { %v2394_v60 = vsel %vm882_vm2, %v3906_v59, 0.0 }
 0xbb9   : > { %2395 = vadd.xlane.f32.xlu1 %v2394_v60 }
 0xc44   : > { %v2393_v62 = vpop.xlane.xlu0 %2392 }
 0xc45   : > { %3907 = vrcp.f32 %v2393_v62  ;;  %v3342_v62 = vld [vmem:[%s4987_s10] ss:$0 sm:$0xff] }
 0xc46   : > { %v2396_v63 = vpop.xlane.xlu1 %2395 }
 0xc47   : > { %3909 = vrcp.f32 %v2396_v63 }
 0xc4f   : > { %v3908_v0 = vpop.eup %3907 }
 0xc50   : > { %v2399_v5 = vmul.f32 %v3908_v0, %v3904_v57 }
 0xc51   : > { %v3910_v2 = vpop.eup %3909 }
 0xc52   : > { %v3399_v3 = vpack.c.bf16 %v2399_v5, %v2399_v5  ;;  %v2400_v4 = vmul.f32 %v3910_v2, %v3906_v59 }
 0xc54   : > { %3334 = vst.msk [vmem:[%s4519_s23 + $0x18] sm:$0xf] %vm1542_vm3, %v3399_v3  ;;  %v3400_v6 = vpack.c.bf16 %v2400_v4, %v2400_v4  ;;  %v2401_v7 = vpack.c.bf16 %v2400_v4, %v2399_v5  ;;  %v3343_v3 = vld [vmem:[%s4988_s11] ss:$0 sm:$0xff] }
 0xc56   : > { %3335 = vst.msk [vmem:[%s4519_s23 + $0x1c] sm:$0xf] %vm1542_vm3, %v3400_v6  ;;  %3717 = vmatmul.mubr.msk.bf16.vlgmr.msra.gmra.mrb[44].mxu0 %vm882_vm2, %v2401_v7 }
 0xc57   : > { %2664 = vmatprep.mubr.bf16.mxu0 %v4061_v46 }
 0xd29   : > { %v2449_v8 = vpop.f32.mrb[44].mxu0 }
 0xd2a   : > { %v3718_v9 = vpop.f32.mrb[45].mxu0 }
 0xd2b   : > { %v2452_v10 = vpop.f32.mrb[46].mxu0  ;;  %v3874_v9 = vld [vmem:[%s4934_s14 + $0x28] sm:$0xff]  }
 0xd2c   : > { %v2456_v11 = vpack.c.bf16 %v2452_v10, %v2449_v8  ;;  %v3719_v12 = vpop.f32.mrb[47].mxu0  ;;  %v3875_v10 = vld [vmem:[%s4934_s14 + $0x70] sm:$0xff]  }
 0xd2d   : > { %v3877_v12 = vld [vmem:[%s4934_s14 + $0x78] sm:$0xff]  }
 0xd2e   : > { %3723 = vmatmul.mubr.msk.bf16.vlgmr.msra.gmra.mrb[44].mxu1 %vm882_vm2, %v2456_v11  ;;  %v3876_v11 = vld [vmem:[%s4934_s14 + $0x30] sm:$0xff]  }
 0xd2f   : > { %3489 = vmatpush3.bf16.msra.mxu1 %v3864_v48 }
 0xd30   : > { %3490 = vmatprep.subr.bf16.mxu1 %v3865_v49 }
 0xd33   : > { %3491 = vmatpush3.bf16.msra.mxu1 %v3866_v50 }
 0xd34   : > { %3492 = vmatprep.subr.bf16.mxu1 %v3867_v51 }
 0xd37   : > { %3493 = vmatpush3.bf16.msra.mxu1 %v3868_v1 }
 0xd38   : > { %3494 = vmatprep.subr.bf16.mxu1 %v3869_v33 }
 0xd3b   : > { %3495 = vmatpush3.bf16.msra.mxu1 %v3870_v36 }
 0xd3c   : > { %3496 = vmatprep.subr.bf16.mxu1 %v3871_v52 }
 0xd3f   : > { %3497 = vmatpush3.bf16.msra.mxu1 %v3872_v53 }
 0xd40   : > { %3498 = vmatprep.subr.bf16.mxu1 %v3873_v54 }
 0xd43   : > { %3499 = vmatpush3.bf16.msra.mxu1 %v3874_v9 }
 0xd44   : > { %3500 = vmatprep.subr.bf16.mxu1 %v3875_v10 }
 0xd47   : > { %3501 = vmatpush3.bf16.msra.mxu1 %v3876_v11 }
 0xd48   : > { %3502 = vmatprep.subr.bf16.mxu1 %v3877_v12 }
 0xe01   : > { %v2503_v13 = vpop.f32.mrb[44].mxu1 }
 0xe02   : > { %v2510_v15 = vadd.f32 %v2503_v13, %v2230_v39  ;;  %v3724_v16 = vpop.f32.mrb[45].mxu1  ;;  %v3851_v39 = vld [vmem:[%s4932_s12] ss:$8 sps:$4 sm:$0xff]   ;;  %v3878_v13 = vld [vmem:[%s4934_s14 + $0x38] sm:$0xff]  }
 0xe03   : > { %v2506_v17 = vpop.f32.mrb[46].mxu1  ;;  %3503 = vmatpush3.bf16.msra.mxu1 %v3878_v13 }
 0xe04   : > { %v2519_v18 = vadd.f32 %v3341_v14, %v2510_v15  ;;  %v2511_v19 = vadd.f32 %v2506_v17, %v2231_v42  ;;  %v3725_v20 = vpop.f32.mrb[47].mxu1  ;;  %v3859_v42 = vld [vmem:[%s4932_s12 + $0x24] ss:$8 sps:$4 sm:$0xff]   ;;  %v2577_v17 = vld [vmem:[%s4933_s13] sm:$0x3] }
 0xe06   : > { %v2520_v21 = vadd.f32 %v3341_v14, %v2511_v19  ;;  %v2521_v25 = vadd.f32 %v2519_v18, %v4347_v22  ;;  %v2579_v14 = vlaneseq }
 0xe08   : > { %v2525_v26 = vsel %vm756_vm1, %v2521_v25, 0.0  ;;  %v2522_v27 = vadd.f32 %v2520_v21, %v4349_v23  ;;  %v3853_v23 = vld [vmem:[%s4932_s12 + $0x4] ss:$8 sps:$4 sm:$0xff]   ;;  %v2580_v15 = vshrl.u32 %v2579_v14, 7 }
 0xe09   : > { %2526 = vadd.xlane.f32.xlu0 %v2525_v26  ;;  %2632 = vmatprep.subr.bf16.mxu0 %v3853_v23  ;;  %v3353_v23 = vld [vmem:[%s4935_s15] ss:$0 sm:$0xff] }
 0xe0a   : > { %v2528_v24 = vsel %vm756_vm1, %v2522_v27, 0.0  ;;  %2633 = vmatpush1.bf16.msra.mxu0 %v3851_v39  ;;  %v2581_v16 = vsub.s32 0, %v2580_v15  ;;  %v2585_v18 = vsub.s32 1, %v2580_v15 }
 0xe0b   : > { %2529 = vadd.xlane.f32.xlu1 %v2528_v24  ;;  %2634 = vmatprep.subr.bf16.mxu0 %v3856_v40 }
 0xe0c   : > { %v2582_v19 = vrot.slane %v2577_v17, %v2581_v16  ;;  %v2586_v20 = vrot.slane %v2577_v17, %v2585_v18 }
 0xe0e   : > { %2635 = vmatpush1.bf16.msra.mxu0 %v3854_v41 }
 0xe0f   : > { %2636 = vmatprep.subr.bf16.mxu0 %v3859_v42 }
 0xe12   : > { %2637 = vmatpush1.bf16.msra.mxu0 %v3857_v43 }
 0xe13   : > { %2638 = vmatprep.subr.bf16.mxu0 %v3862_v45 }
 0xe16   : > { %2639 = vmatpush1.bf16.msra.mxu0 %v3860_v44 }
 0xe96   : > { %v2527_v28 = vpop.xlane.xlu0 %2526 }
 0xe97   : > { %v2532_v29 = vmul.f32 0.015625, %v2527_v28 }
 0xe98   : > { %v2530_v30 = vpop.xlane.xlu1 %2529 }
 0xe99   : > { %v2534_v31 = vsub.f32 %v2521_v25, %v2532_v29  ;;  %v2533_v32 = vmul.f32 0.015625, %v2530_v30 }
 0xe9b   : > { %v2535_v34 = vsub.f32 %v2522_v27, %v2533_v32  ;;  %v2536_v35 = vmul.f32 %v2534_v31, %v2534_v31 }
 0xe9d   : > { %v2538_v37 = vsel %vm756_vm1, %v2536_v35, 0.0  ;;  %v2537_v38 = vmul.f32 %v2535_v34, %v2535_v34 }
 0xe9e   : > { %2539 = vadd.xlane.f32.xlu0 %v2538_v37 }
 0xe9f   : > { %v2541_v22 = vsel %vm756_vm1, %v2537_v38, 0.0 }
 0xea0   : > { %2542 = vadd.xlane.f32.xlu1 %v2541_v22 }
 0xf2b   : > { %v2540_v55 = vpop.xlane.xlu0 %2539 }
 0xf2c   : > { %v2544_v56 = vmul.f32 0.015625, %v2540_v55 }
 0xf2d   : > { %v2543_v57 = vpop.xlane.xlu1 %2542 }
 0xf2e   : > { %v2546_v58 = vadd.f32 1e-05, %v2544_v56  ;;  %v2545_v59 = vmul.f32 0.015625, %v2543_v57 }
 0xf30   : > { %3911 = vrsqrt.f32 %v2546_v58  ;;  %v2547_v60 = vadd.f32 1e-05, %v2545_v59 }
 0xf32   : > { %3913 = vrsqrt.f32 %v2547_v60 }
 0xf3a   : > { %v3912_v61 = vpop.eup %3911 }
 0xf3b   : > { %v2550_v63 = vmul.f32 %v3912_v61, %v2534_v31 }
 0xf3c   : > { %v3914_v0 = vpop.eup %3913 }
 0xf3d   : > { %v2558_v5 = vmul.f32 %v3342_v62, %v2550_v63  ;;  %v2551_v2 = vmul.f32 %v3914_v0, %v2535_v34 }
 0xf3f   : > { %v2559_v4 = vmul.f32 %v3342_v62, %v2551_v2  ;;  %v2566_v6 = vadd.f32 %v3343_v3, %v2558_v5 }
 0xf41   : > { %v2567_v7 = vadd.f32 %v3343_v3, %v2559_v4 }
 0xf43   : > { %v2568_v8 = vpack.c.bf16 %v2567_v7, %v2566_v6 }
 0xf45   : > { %3352 = vmatmul.mubr.msk.bf16.vlgmr.msra.gmra.mrb[48].mxu0 %vm756_vm1, %v2568_v8 }
0x1018   : > { %v2666_v21 = vpop.f32.mrb[48].mxu0 }
0x1019   : > { %v2667_v25 = vadd.f32 %v2666_v21, %v2582_v19  ;;  %v2668_v26 = vpop.f32.mrb[49].mxu0 }
0x101a   : > { %v2669_v27 = vadd.f32 %v2668_v26, %v2586_v20  ;;  %v2670_v24 = vpop.f32.mrb[50].mxu0 }
0x101b   : > { %v2671_v28 = vadd.f32 %v2670_v24, %v2582_v19  ;;  %v2672_v29 = vpop.f32.mrb[51].mxu0  ;;  %v2675_v31 = vmax.f32 %v2667_v25, 0.0 }
0x101c   : > { %v2673_v30 = vadd.f32 %v2672_v29, %v2586_v20  ;;  %v2676_v34 = vmax.f32 %v2669_v27, 0.0 }
0x101d   : > { %v2677_v32 = vmax.f32 %v2671_v28, 0.0 }
0x101e   : > { %v2678_v35 = vmax.f32 %v2673_v30, 0.0 }
0x101f   : > { %v2679_v37 = vpack.c.bf16 %v2677_v32, %v2675_v31 }
0x1020   : > { %v2680_v38 = vpack.c.bf16 %v2678_v35, %v2676_v34 }
0x1022   : > { %2848 = vmatprep.mubr.bf16.mxu1 %v2680_v38 }
0x1023   : > { %2849 = vmatmul.mubr.bf16.vlgmr.msra.gmra.mrb[48].mxu1 %v2679_v37 }
0x10f6   : > { %v3504_v22 = vpop.f32.mrb[48].mxu1 }
0x10f7   : > { %v3505_v39 = vpop.f32.mrb[49].mxu1 }
0x10f8   : > { %v3506_v40 = vadd.f32 %v3505_v39, %v3504_v22  ;;  %v3507_v41 = vpop.f32.mrb[50].mxu1 }
0x10f9   : > { %v3508_v42 = vpop.f32.mrb[51].mxu1 }
0x10fa   : > { %v2851_v43 = vadd.f32 %v3506_v40, %v3353_v23  ;;  %v3509_v44 = vadd.f32 %v3508_v42, %v3507_v41 }
0x10fc   : > { %v2854_v45 = vadd.f32 %v3509_v44, %v3353_v23  ;;  %v2857_v46 = vadd.f32 %v2851_v43, %v2566_v6 }
0x10fe   : > { %v2861_v47 = vsel %vm756_vm1, %v2857_v46, 0.0  ;;  %v2858_v48 = vadd.f32 %v2854_v45, %v2567_v7 }
0x10ff   : > { %2862 = vadd.xlane.f32.xlu0 %v2861_v47 }
0x1100   : > { %v2864_v49 = vsel %vm756_vm1, %v2858_v48, 0.0 }
0x1101   : > { %2865 = vadd.xlane.f32.xlu1 %v2864_v49 }
0x118c   : > { %v2863_v50 = vpop.xlane.xlu0 %2862 }
0x118d   : > { %v2867_v51 = vmul.f32 0.015625, %v2863_v50 }
0x118e   : > { %v2866_v1 = vpop.xlane.xlu1 %2865 }
0x118f   : > { %v4765_v33 = vsub.f32 %v2857_v46, %v2867_v51  ;;  %v2868_v36 = vmul.f32 0.015625, %v2866_v1 }
0x1191   : > { %v4767_v52 = vsub.f32 %v2858_v48, %v2868_v36  ;;  %v2871_v53 = vmul.f32 %v4765_v33, %v4765_v33 }
0x1193   : > { %v2873_v54 = vsel %vm756_vm1, %v2871_v53, 0.0  ;;  %v2872_v55 = vmul.f32 %v4767_v52, %v4767_v52 }
0x1194   : > { %2874 = vadd.xlane.f32.xlu0 %v2873_v54 }
0x1195   : > { %v2876_v56 = vsel %vm756_vm1, %v2872_v55, 0.0 }
0x1196   : > { %2877 = vadd.xlane.f32.xlu1 %v2876_v56 }
0x1197   : > { %3932 = shalt.err (!%p3929_p5)
}
0x1198   : > { %s3933_s23 = scalar_lea.hbm %s4785_s3, 512  ;;  %s3937_s5 = scalar_lea.hbm %s4939_s19, 1024 }
0x1199   : > { %p3934_p6 = scmp.ne.s32.totalorder %s4785_s3, %s3933_s23  ;;  %p3938_p10 = scmp.lt.u32.totalorder %s4785_s3, %s4939_s19 }
0x119a   : > { %p3939_p11 = scmp.lt.u32.totalorder %s3937_s5, %s3933_s23  ;;  %p3941_p13 = scmp.lt.u32.totalorder %s3933_s23, %s4785_s3 }
0x119b   : > { %p3935_p7 = pnand %p3934_p6, %p4216_p4 }
0x119c   : > { %p3940_p12 = por %p3939_p11, %p3938_p10 }
0x119d   : > { %p3936_p9 = pneg %p3935_p7 }
0x119e   : > { %p3942_p0 = por %p3941_p13, %p3940_p12 }
0x11a0   : > { %p3943_p1 = pnand %p3942_p0, %p3936_p9 }
0x11a2   : > { %3946 = shalt.err (!%p3943_p1)
}
0x11a3   : > { %s4063_s9 = smov 64   ;;  %s4064_s0 = smov 4  }
0x11a4   : > { %3727 = dma.vmem_to_hbm [thread:$0]  (%p4216_p4), %s4788_s26, 512, %s4785_s3, %s2911_s2, %s4063_s9, %s4063_s9, %s4064_s0  }
0x11a5   : > { %s4990_s8 = sshll.u32 %s4049_s24, 9  ;;  %s2967_s5 = sshll.u32 %s4432_s18, 4  ;;  %s4825_s5 = int_to_ptr.vmem [resolvable:$true] %s2967_s5 }
0x11a6   : > { %s4822_s21 = scalar_lea.hbm %s4940_s20, %s4990_s8  ;;  %s3947_s6 = scalar_lea.vmem %s4825_s5, 512 }
0x11a7   : > { %p3948_p2 = scmp.ne.s32.totalorder %s4825_s5, %s3947_s6  ;;  %s4065_s10 = smov [#allocation8]  }
0x11a8   : > { %s3951_s11 = sshll.u32 %s4065_s10, 4  ;;  %s3952_s11 = int_to_ptr.vmem [resolvable:$false] %s3951_s11 }
0x11a9   : > { %p3949_p3 = pnand %p3948_p2, %p4216_p4  ;;  %s3953_s3 = scalar_lea.vmem %s3952_s11, 1024 }
0x11aa   : > { %p3954_p6 = scmp.lt.s32.totalorder %s4825_s5, %s3952_s11  ;;  %p3955_p7 = scmp.lt.s32.totalorder %s3953_s3, %s3947_s6 }
0x11ab   : > { %p3950_p5 = pneg %p3949_p3 }
0x11ac   : > { %p3956_p9 = por %p3955_p7, %p3954_p6 }
0x11ae   : > { %p3957_p10 = pnand %p3956_p9, %p3950_p5 }
0x11b0   : > { %3960 = shalt.err (!%p3957_p10)
}
0x11b1   : > { %s3961_s18 = scalar_lea.hbm %s4822_s21, 512  ;;  %s3965_s10 = scalar_lea.hbm %s4940_s20, 1024 }
0x11b2   : > { %p3962_p11 = scmp.ne.s32.totalorder %s4822_s21, %s3961_s18  ;;  %p3966_p0 = scmp.lt.u32.totalorder %s4822_s21, %s4940_s20 }
0x11b3   : > { %p3967_p1 = scmp.lt.u32.totalorder %s3965_s10, %s3961_s18  ;;  %p3969_p3 = scmp.lt.u32.totalorder %s3961_s18, %s4822_s21 }
0x11b4   : > { %p3963_p12 = pnand %p3962_p11, %p4216_p4 }
0x11b5   : > { %p3968_p2 = por %p3967_p1, %p3966_p0 }
0x11b6   : > { %p3964_p13 = pneg %p3963_p12 }
0x11b7   : > { %p3970_p5 = por %p3969_p3, %p3968_p2 }
0x11b9   : > { %p3971_p6 = pnand %p3970_p5, %p3964_p13 }
0x11bb   : > { %3974 = shalt.err (!%p3971_p6)
}
0x11bc   : > { %3728 = dma.vmem_to_hbm [thread:$0]  (%p4216_p4), %s4825_s5, 512, %s4822_s21, %s2911_s2, %s4063_s9, %s4063_s9, %s4064_s0  }
0x11bd   : > { %s3130_s1 = sshll.u32 %s4426_s28, 4  ;;  %v3370_v0 = vld [vmem:[%s4936_s16] ss:$0 sm:$0xff]  ;;  %s3401_s9 = sshll.u32 %s4049_s24, 8 }
0x11be   : > { %v3371_v3 = vld [vmem:[%s4937_s17] ss:$0 sm:$0xff]  ;;  %s670_s0 = scalar_lea.vmem [#allocation4], %s3130_s1  ;;  %s4991_s26 = sld [smem:[#allocation28_spill]] }
0x11bf   : > { %s2931_s21 = sshll.u32 %s670_s0, 4  ;;  %s2906_s24 = scalar_lea.sflag [#allocation5], %s4426_s28  ;;  %s4868_s21 = int_to_ptr.vmem [resolvable:$true] %s2931_s21 }
0x11c0   : > { %s3975_s10 = scalar_lea.vmem %s4868_s21, 256  ;;  %s4066_s23 = smov [#allocation4]  }
0x11c1   : > { %p3976_p7 = scmp.ne.s32.totalorder %s4868_s21, %s3975_s10  ;;  %s3979_s11 = sshll.u32 %s4066_s23, 4  ;;  %s3980_s11 = int_to_ptr.vmem [resolvable:$false] %s3979_s11 }
0x11c2   : > { %s3981_s1 = scalar_lea.vmem %s3980_s11, 512  ;;  %p3982_p11 = scmp.lt.s32.totalorder %s4868_s21, %s3980_s11 }
0x11c3   : > { %p3977_p9 = pnand %p3976_p7, %p4216_p4  ;;  %p3983_p12 = scmp.lt.s32.totalorder %s3981_s1, %s3975_s10 }
0x11c4   : > { %s4866_s8 = scalar_lea.hbm %s4991_s26, %s3401_s9 }
0x11c5   : > { %p3978_p10 = pneg %p3977_p9  ;;  %p3984_p13 = por %p3983_p12, %p3982_p11 }
0x11c7   : > { %p3985_p0 = pnand %p3984_p13, %p3978_p10 }
0x1221   : > { %v2875_v57 = vpop.xlane.xlu0 %2874 }
0x1222   : > { %v2879_v58 = vmul.f32 0.015625, %v2875_v57 }
0x1223   : > { %v2878_v59 = vpop.xlane.xlu1 %2877 }
0x1224   : > { %v2881_v60 = vadd.f32 1e-05, %v2879_v58  ;;  %v2880_v61 = vmul.f32 0.015625, %v2878_v59 }
0x1226   : > { %3915 = vrsqrt.f32 %v2881_v60  ;;  %v2882_v62 = vadd.f32 1e-05, %v2880_v61 }
0x1228   : > { %3917 = vrsqrt.f32 %v2882_v62 }
0x1230   : > { %v3916_v63 = vpop.eup %3915 }
0x1231   : > { %v2885_v5 = vmul.f32 %v3916_v63, %v4765_v33 }
0x1232   : > { %v3918_v2 = vpop.eup %3917 }
0x1233   : > { %v2893_v4 = vmul.f32 %v3370_v0, %v2885_v5  ;;  %v2886_v6 = vmul.f32 %v3918_v2, %v4767_v52 }
0x1235   : > { %v2901_v7 = vadd.f32 %v3371_v3, %v2893_v4  ;;  %v2894_v8 = vmul.f32 %v3370_v0, %v2886_v6 }
0x1237   : > { %v2902_v9 = vadd.f32 %v3371_v3, %v2894_v8  ;;  %2903 = vst.msk [vmem:[%s670_s0] sm:$0xff] %vm756_vm1, %v2901_v7 }
0x1239   : > { %2904 = vst.msk [vmem:[%s670_s0 + $0x8] sm:$0xff] %vm756_vm1, %v2902_v9 }
0x123a   : > { %3988 = shalt.err (!%p3985_p0)
}
0x123b   : > { %s3989_s6 = scalar_lea.hbm %s4866_s8, 256  ;;  %s3993_s2 = scalar_lea.hbm %s4991_s26, 512 }
0x123c   : > { %p3990_p1 = scmp.ne.s32.totalorder %s4866_s8, %s3989_s6  ;;  %p3994_p5 = scmp.lt.u32.totalorder %s4866_s8, %s4991_s26 }
0x123d   : > { %p3995_p6 = scmp.lt.u32.totalorder %s3993_s2, %s3989_s6  ;;  %p3997_p9 = scmp.lt.u32.totalorder %s3989_s6, %s4866_s8 }
0x123e   : > { %p3991_p2 = pnand %p3990_p1, %p4216_p4 }
0x123f   : > { %p3996_p7 = por %p3995_p6, %p3994_p5 }
0x1240   : > { %p3992_p3 = pneg %p3991_p2 }
0x1241   : > { %p3998_p10 = por %p3997_p9, %p3996_p7 }
0x1243   : > { %p3999_p11 = pnand %p3998_p10, %p3992_p3 }
0x1245   : > { %4002 = shalt.err (!%p3999_p11)
}
0x1246   : > { %s4067_s5 = smov 128   ;;  %s4068_s18 = smov 8  }
0x1247   : > { %3726 = dma.vmem_to_hbm [thread:$0]  (%p4216_p4), %s4868_s21, 256, %s4866_s8, %s2906_s24, %s4067_s5, %s4067_s5, %s4068_s18  }
0x1248 PF: > { %s4992_s10 = sld [smem:[#allocation11_spill]]  ;;  %p3742_p12 = scmp.ge.s32.totalorder %s4057_s25, 2 }
0x124a   : > { %p3733_p13 = pnand %p3742_p12, %p4225_p8 }
0x124e   : > { %s2982_s23 = sand.u32 1, %s4992_s10  }
0x124f   : > { %s2983_s11 = scalar_lea.sflag [#allocation5], %s2982_s23 }
0x1250   : > { %4028 = dma.done.wait (!%p3733_p13), %s2983_s11, 256  }
0x1251   : > { %4030 = vsyncadd (!%p3733_p13), %s2983_s11, 4294967040  ;;  %s4993_s1 = sadd.s32 4294967294, %s4057_s25  }
0x1252   : > { %s2991_s6 = sand.u32 1, %s4993_s1  }
0x1253   : > { %s2992_s3 = scalar_lea.sflag [#allocation7], %s2991_s6 }
0x1254   : > { %4032 = dma.done.wait (!%p3733_p13), %s2992_s3, 1024  }
0x1255   : > { %4034 = vsyncadd (!%p3733_p13), %s2992_s3, 4294966272  ;;  %s37_s25 = sadd.s32 1, %s4057_s25   ;;  %s4994_s4 = sld [smem:[#allocation12_spill]] }
0x1256   : > { %p34_p4 = scmp.ge.s32.totalorder %s37_s25, 4   ;;  %s4995_s23 = sld [smem:[#allocation15_spill]] }
0x1257   : > { %s4996_s24 = sld [smem:[#allocation13_spill]]  ;;  %s4997_s2 = sld [smem:[#allocation14_spill]] }
0x1258   : > { %s4998_s1 = smov %s4041_s22  ;;  %36 = sbr.rel (!%p34_p4) target bundleno = 20 (0x14), region = 205 }
0x125b   : > { %s4999_s22 = smov %s4994_s4 }
0x125f   :  { %3006 = vsyncpa [#allocation5], 1 }
0x1260   :  { %3008 = vsyncpa [#allocation5 + $0x1], 1 }
0x1261   :  { %3009 = vsyncpa [#allocation7], 1 }
0x1262   :  { %3011 = vsyncpa [#allocation7 + $0x1], 1 }

</bundles_post_ra>
